<compile_context>
chip_gen: v6e
topology: v6e:2x2x1
jax: 0.10.0
libtpu: 0.0.40
codegen_flags: <defaults>
</compile_context>

<pallas_src>
import jax
import jax.numpy as jnp
from jax.experimental import pallas as pl
from jax.experimental.pallas import tpu as pltpu

INPUT = 784         # fixed by Encoder/Decoder defaults
INPUT_PAD = 896     # 7*128, lane-dense padded output width (extra cols sliced off)
HIDDEN = 200        # fixed by Encoder/Decoder defaults (logical)
HIDDEN_PAD = 256    # MXU-aligned padded hidden; pad cols/rows are exact zeros
LATENT_NUM = 4      # small, configurable in Model.__init__
LATENT_DIM = 8      # small, configurable in Model.__init__
LATENT = LATENT_NUM * LATENT_DIM


def _round_up(n, m):
    return ((n + m - 1) // m) * m


# ---------------- fused Pallas kernel ----------------

def fused_vae_kernel(inv_temp_ref, x_ref, g_ref,
                     ew1_ref, eb1_ref, ew2_ref, eb2_ref,
                     dw1_ref, db1_ref, dw2_ref, db2_ref,
                     zla_ref, xr_ref):
    tb = x_ref.shape[0]

    # ---- Encoder: fc1 -> tanh -> fc2 (hidden padded; padded columns are 0) ----
    h = jnp.tanh(
        jnp.dot(x_ref[...], ew1_ref[...], preferred_element_type=jnp.float32)
        + eb1_ref[...])
    log_alpha = (
        jnp.dot(h, ew2_ref[...], preferred_element_type=jnp.float32) + eb2_ref[...])

    # ---- RelaxedOneHotCategorical rsample: softmax((logits + gumbel) * 1/temp)
    # grouped over each latent's LATENT_DIM columns via a single reshape pass.
    inv_t = inv_temp_ref[0]
    y = (log_alpha + g_ref[...]) * inv_t
    y3 = y.reshape(tb, LATENT_NUM, LATENT_DIM)
    m = jnp.max(y3, axis=-1, keepdims=True)
    e = jnp.exp(y3 - m)
    inv_den = 1.0 / jnp.sum(e, axis=-1, keepdims=True)   # per-row reciprocal
    z = (e * inv_den).reshape(tb, LATENT)

    # Pack z and log_alpha into one output stream: [z | log_alpha].
    zla_ref[:, :LATENT] = z
    zla_ref[:, LATENT:] = log_alpha

    # ---- Decoder + Model.decode: fc1 -> tanh -> fc2 -> sigmoid ----
    h2 = jnp.tanh(
        jnp.dot(z, dw1_ref[...], preferred_element_type=jnp.float32) + db1_ref[...])
    xr_ref[...] = jax.nn.sigmoid(
        jnp.dot(h2, dw2_ref[...], preferred_element_type=jnp.float32) + db2_ref[...])


# ---------------- wrappers ----------------

def _linear_init(key, fan_in, fan_out):
    # deterministic, PyTorch-Linear-style uniform(-1/sqrt(fan_in), 1/sqrt(fan_in))
    kw, kb = jax.random.split(key)
    bound = 1.0 / jnp.sqrt(jnp.float32(fan_in))
    w = jax.random.uniform(kw, (fan_in, fan_out), jnp.float32, -bound, bound)
    b = jax.random.uniform(kb, (1, fan_out), jnp.float32, -bound, bound)
    return w, b


def init_params(key):
    """Weights are stored already zero-padded to the MXU/lane-aligned shapes,
    so model_forward does no per-call padding (bit-exact: padded entries are 0)."""
    k1, k2, k3, k4 = jax.random.split(key, 4)
    enc_w1, enc_b1 = _linear_init(k1, INPUT, HIDDEN)
    enc_w2, enc_b2 = _linear_init(k2, HIDDEN, LATENT)
    dec_w1, dec_b1 = _linear_init(k3, LATENT, HIDDEN)
    dec_w2, dec_b2 = _linear_init(k4, HIDDEN, INPUT)

    hp = HIDDEN_PAD - HIDDEN
    op = INPUT_PAD - INPUT
    return dict(
        enc_w1=jnp.pad(enc_w1, ((0, 0), (0, hp))),          # (784, 256)
        enc_b1=jnp.pad(enc_b1, ((0, 0), (0, hp))),          # (1, 256)
        enc_w2=jnp.pad(enc_w2, ((0, hp), (0, 0))),          # (256, 32)
        enc_b2=enc_b2,                                       # (1, 32)
        dec_w1=jnp.pad(dec_w1, ((0, 0), (0, hp))),          # (32, 256)
        dec_b1=jnp.pad(dec_b1, ((0, 0), (0, hp))),          # (1, 256)
        dec_w2=jnp.pad(dec_w2, ((0, hp), (0, op))),         # (256, 896)
        dec_b2=jnp.pad(dec_b2, ((0, 0), (0, op))),          # (1, 896)
    )


@jax.jit
def model_forward(x, params, temp, gumbel):
    """x: (B, 784) f32; temp: (1,) f32; gumbel: (B, LN, LD) f32.

    Returns (z, x_recon, log_alpha), mirroring PyTorch's (z, x_recon, v_dist)
    with v_dist represented by its logits log_alpha.
    """
    B = x.shape[0]
    f32 = jnp.float32

    g2d = gumbel.reshape(B, LATENT)

    # Adaptive batch tile: >=2 grid steps whenever B > 8 (megacore split on
    # v7x, pipeline overlap everywhere), capped at 1024 rows.
    B8 = _round_up(B, 8)
    TB = min(1024, max(8, _round_up(-(-B8 // 2), 8)))
    Bp = _round_up(B, TB)
    if Bp != B:
        x = jnp.pad(x, ((0, Bp - B), (0, 0)))
        g2d = jnp.pad(g2d, ((0, Bp - B), (0, 0)))

    inv_temp = (1.0 / temp).astype(f32)            # scalar reciprocal, once
    grid = (Bp // TB,)

    flops = 2 * Bp * (INPUT * HIDDEN_PAD + HIDDEN_PAD * LATENT
                      + LATENT * HIDDEN_PAD + HIDDEN_PAD * INPUT_PAD)
    transcendentals = Bp * (HIDDEN_PAD + LATENT + HIDDEN_PAD + INPUT_PAD)
    bytes_accessed = 4 * (Bp * (INPUT + LATENT + 2 * LATENT + INPUT_PAD)
                          + INPUT * HIDDEN_PAD + 2 * HIDDEN_PAD * LATENT
                          + HIDDEN_PAD * INPUT_PAD
                          + 2 * HIDDEN_PAD + LATENT + INPUT_PAD)

    def row_spec(width):
        return pl.BlockSpec((TB, width), lambda i: (i, 0))

    def weight_spec(r, c):
        # Constant index map -> fetched once; single-buffer to save VMEM.
        return pl.BlockSpec((r, c), lambda i: (0, 0),
                            pipeline_mode=pl.Buffered(1))

    zla, xr_pad = pl.pallas_call(
        fused_vae_kernel,
        grid=grid,
        in_specs=[
            pl.BlockSpec(memory_space=pltpu.MemorySpace.SMEM),       # inv_temp
            row_spec(INPUT),                                          # x tile
            row_spec(LATENT),                                         # gumbel tile
            weight_spec(INPUT, HIDDEN_PAD), weight_spec(1, HIDDEN_PAD),   # enc fc1
            weight_spec(HIDDEN_PAD, LATENT), weight_spec(1, LATENT),      # enc fc2
            weight_spec(LATENT, HIDDEN_PAD), weight_spec(1, HIDDEN_PAD),  # dec fc1
            weight_spec(HIDDEN_PAD, INPUT_PAD), weight_spec(1, INPUT_PAD),# dec fc2
        ],
        out_specs=[row_spec(2 * LATENT), row_spec(INPUT_PAD)],
        out_shape=[
            jax.ShapeDtypeStruct((Bp, 2 * LATENT), f32),   # [z | log_alpha]
            jax.ShapeDtypeStruct((Bp, INPUT_PAD), f32),    # x_recon (lane-padded)
        ],
        compiler_params=pltpu.CompilerParams(
            dimension_semantics=("parallel",),
            vmem_limit_bytes=40 * 1024 * 1024),
        cost_estimate=pl.CostEstimate(
            flops=flops, transcendentals=transcendentals,
            bytes_accessed=bytes_accessed),
    )(inv_temp, x, g2d,
      params["enc_w1"], params["enc_b1"], params["enc_w2"], params["enc_b2"],
      params["dec_w1"], params["dec_b1"], params["dec_w2"], params["dec_b2"])

    z = zla[:B, :LATENT].reshape(B, LATENT_NUM, LATENT_DIM)
    log_alpha = zla[:B, LATENT:].reshape(B, LATENT_NUM, LATENT_DIM)
    x_recon = xr_pad[:B, :INPUT]
    return z, x_recon, log_alpha


if __name__ == "__main__":
    key = jax.random.PRNGKey(0)
    k_param, k_x, k_g = jax.random.split(key, 3)

    B = 8  # small, sublane-aligned batch
    params = init_params(k_param)
    x = jax.random.uniform(k_x, (B, INPUT), jnp.float32)            # MNIST-like pixels in [0, 1]
    temp = jnp.array([0.5], dtype=jnp.float32)
    gumbel = jax.random.gumbel(k_g, (B, LATENT_NUM, LATENT_DIM), jnp.float32)

    z, x_recon, log_alpha = model_forward(x, params, temp, gumbel)
    jax.block_until_ready((z, x_recon, log_alpha))

    assert z.shape == (B, LATENT_NUM, LATENT_DIM)
    assert x_recon.shape == (B, INPUT)
    assert log_alpha.shape == (B, LATENT_NUM, LATENT_DIM)
    # z rows must be valid simplex points (softmax output)
    assert bool(jnp.all(jnp.abs(jnp.sum(z, axis=-1) - 1.0) < 1e-4))
    assert bool(jnp.all((x_recon >= 0.0) & (x_recon <= 1.0)))

    print("KERNEL_OK")
</pallas_src>

<mosaic_0001>
module attributes {stable_mosaic.version = 11 : i64} {
  func.func @fused_vae_kernel(%arg0: i32, %arg1: memref<1xf32, #tpu.memory_space<smem>>, %arg2: memref<8x784xf32, #tpu.memory_space<vmem>>, %arg3: memref<8x32xf32, #tpu.memory_space<vmem>>, %arg4: memref<784x256xf32, #tpu.memory_space<vmem>>, %arg5: memref<1x256xf32, #tpu.memory_space<vmem>>, %arg6: memref<256x32xf32, #tpu.memory_space<vmem>>, %arg7: memref<1x32xf32, #tpu.memory_space<vmem>>, %arg8: memref<32x256xf32, #tpu.memory_space<vmem>>, %arg9: memref<1x256xf32, #tpu.memory_space<vmem>>, %arg10: memref<256x896xf32, #tpu.memory_space<vmem>>, %arg11: memref<1x896xf32, #tpu.memory_space<vmem>>, %arg12: memref<8x64xf32, #tpu.memory_space<vmem>>, %arg13: memref<8x896xf32, #tpu.memory_space<vmem>>) attributes {dimension_semantics = [#tpu.dimension_semantics<parallel>], iteration_bounds = array<i64: 1>, scalar_prefetch = 0 : i64, scratch_operands = 0 : i64, tpu.core_type = #tpu.core_type<tc>, window_params = [{transform_indices = @transform_0, window_bounds = array<i64: 1>}, {transform_indices = @transform_1, window_bounds = array<i64: 8, 784>}, {transform_indices = @transform_2, window_bounds = array<i64: 8, 32>}, {pipeline_mode = #tpu.pipeline_mode<synchronous>, transform_indices = @transform_3, window_bounds = array<i64: 784, 256>}, {pipeline_mode = #tpu.pipeline_mode<synchronous>, transform_indices = @transform_4, window_bounds = array<i64: 1, 256>}, {pipeline_mode = #tpu.pipeline_mode<synchronous>, transform_indices = @transform_5, window_bounds = array<i64: 256, 32>}, {pipeline_mode = #tpu.pipeline_mode<synchronous>, transform_indices = @transform_6, window_bounds = array<i64: 1, 32>}, {pipeline_mode = #tpu.pipeline_mode<synchronous>, transform_indices = @transform_7, window_bounds = array<i64: 32, 256>}, {pipeline_mode = #tpu.pipeline_mode<synchronous>, transform_indices = @transform_8, window_bounds = array<i64: 1, 256>}, {pipeline_mode = #tpu.pipeline_mode<synchronous>, transform_indices = @transform_9, window_bounds = array<i64: 256, 896>}, {pipeline_mode = #tpu.pipeline_mode<synchronous>, transform_indices = @transform_10, window_bounds = array<i64: 1, 896>}, {transform_indices = @transform_11, window_bounds = array<i64: 8, 64>}, {transform_indices = @transform_12, window_bounds = array<i64: 8, 896>}]} {
    %c0 = arith.constant 0 : index
    %c0_0 = arith.constant 0 : index
    %0 = vector.load %arg2[%c0, %c0_0] : memref<8x784xf32, #tpu.memory_space<vmem>>, vector<8x784xf32>
    %c0_1 = arith.constant 0 : index
    %c0_2 = arith.constant 0 : index
    %1 = vector.load %arg4[%c0_1, %c0_2] : memref<784x256xf32, #tpu.memory_space<vmem>>, vector<784x256xf32>
    %cst = arith.constant dense<0.000000e+00> : vector<8x256xf32>
    %2 = tpu.matmul %0, %1, %cst {dimension_numbers = #tpu.dot_dimension_numbers<[1], [0], [0], [1], [0, 0, 1, 1], [], []>} : vector<8x784xf32>, vector<784x256xf32>, vector<8x256xf32> -> vector<8x256xf32>
    %c0_3 = arith.constant 0 : index
    %c0_4 = arith.constant 0 : index
    %3 = vector.load %arg5[%c0_3, %c0_4] : memref<1x256xf32, #tpu.memory_space<vmem>>, vector<1x256xf32>
    %4 = vector.broadcast %3 : vector<1x256xf32> to vector<8x256xf32>
    %5 = arith.addf %2, %4 : vector<8x256xf32>
    %6 = math.tanh %5 : vector<8x256xf32>
    %c0_5 = arith.constant 0 : index
    %c0_6 = arith.constant 0 : index
    %7 = vector.load %arg6[%c0_5, %c0_6] : memref<256x32xf32, #tpu.memory_space<vmem>>, vector<256x32xf32>
    %cst_7 = arith.constant dense<0.000000e+00> : vector<8x32xf32>
    %8 = tpu.matmul %6, %7, %cst_7 {dimension_numbers = #tpu.dot_dimension_numbers<[1], [0], [0], [1], [0, 0, 1, 1], [], []>} : vector<8x256xf32>, vector<256x32xf32>, vector<8x32xf32> -> vector<8x32xf32>
    %c0_8 = arith.constant 0 : index
    %c0_9 = arith.constant 0 : index
    %9 = vector.load %arg7[%c0_8, %c0_9] : memref<1x32xf32, #tpu.memory_space<vmem>>, vector<1x32xf32>
    %10 = vector.broadcast %9 : vector<1x32xf32> to vector<8x32xf32>
    %11 = arith.addf %8, %10 : vector<8x32xf32>
    %c0_10 = arith.constant 0 : index
    %12 = memref.load %arg1[%c0_10] : memref<1xf32, #tpu.memory_space<smem>>
    %c0_11 = arith.constant 0 : index
    %c0_12 = arith.constant 0 : index
    %13 = vector.load %arg3[%c0_11, %c0_12] : memref<8x32xf32, #tpu.memory_space<vmem>>, vector<8x32xf32>
    %14 = arith.addf %11, %13 : vector<8x32xf32>
    %15 = vector.broadcast %12 : f32 to vector<8x32xf32>
    %16 = arith.mulf %14, %15 : vector<8x32xf32>
    %17 = vector.shape_cast %16 : vector<8x32xf32> to vector<8x4x8xf32>
    %cst_13 = arith.constant dense<0xFF800000> : vector<8x4xf32>
    %18 = vector.multi_reduction <maximumf>, %17, %cst_13 [2] : vector<8x4x8xf32> to vector<8x4xf32>
    %19 = vector.shape_cast %18 : vector<8x4xf32> to vector<8x4x1xf32>
    %20 = vector.broadcast %19 : vector<8x4x1xf32> to vector<8x4x8xf32>
    %21 = arith.subf %17, %20 : vector<8x4x8xf32>
    %22 = math.exp %21 : vector<8x4x8xf32>
    %cst_14 = arith.constant dense<0.000000e+00> : vector<8x4xf32>
    %23 = vector.multi_reduction <add>, %22, %cst_14 [2] : vector<8x4x8xf32> to vector<8x4xf32>
    %24 = vector.shape_cast %23 : vector<8x4xf32> to vector<8x4x1xf32>
    %cst_15 = arith.constant 1.000000e+00 : f32
    %25 = vector.broadcast %cst_15 : f32 to vector<8x4x1xf32>
    %26 = arith.divf %25, %24 : vector<8x4x1xf32>
    %27 = vector.broadcast %26 : vector<8x4x1xf32> to vector<8x4x8xf32>
    %28 = arith.mulf %22, %27 : vector<8x4x8xf32>
    %29 = vector.shape_cast %28 : vector<8x4x8xf32> to vector<8x32xf32>
    %c0_16 = arith.constant 0 : index
    %c0_17 = arith.constant 0 : index
    %30 = vector.load %arg12[%c0_16, %c0_17] : memref<8x64xf32, #tpu.memory_space<vmem>>, vector<8x32xf32>
    tpu.vector_store %arg12[%c0_16, %c0_17], %29 {strides = array<i32>} : memref<8x64xf32, #tpu.memory_space<vmem>>, vector<8x32xf32>,
    %c0_18 = arith.constant 0 : index
    %c32 = arith.constant 32 : index
    %31 = vector.load %arg12[%c0_18, %c32] : memref<8x64xf32, #tpu.memory_space<vmem>>, vector<8x32xf32>
    tpu.vector_store %arg12[%c0_18, %c32], %11 {strides = array<i32>} : memref<8x64xf32, #tpu.memory_space<vmem>>, vector<8x32xf32>,
    %c0_19 = arith.constant 0 : index
    %c0_20 = arith.constant 0 : index
    %32 = vector.load %arg8[%c0_19, %c0_20] : memref<32x256xf32, #tpu.memory_space<vmem>>, vector<32x256xf32>
    %cst_21 = arith.constant dense<0.000000e+00> : vector<8x256xf32>
    %33 = tpu.matmul %29, %32, %cst_21 {dimension_numbers = #tpu.dot_dimension_numbers<[1], [0], [0], [1], [0, 0, 1, 1], [], []>} : vector<8x32xf32>, vector<32x256xf32>, vector<8x256xf32> -> vector<8x256xf32>
    %c0_22 = arith.constant 0 : index
    %c0_23 = arith.constant 0 : index
    %34 = vector.load %arg9[%c0_22, %c0_23] : memref<1x256xf32, #tpu.memory_space<vmem>>, vector<1x256xf32>
    %35 = vector.broadcast %34 : vector<1x256xf32> to vector<8x256xf32>
    %36 = arith.addf %33, %35 : vector<8x256xf32>
    %37 = math.tanh %36 : vector<8x256xf32>
    %c0_24 = arith.constant 0 : index
    %c0_25 = arith.constant 0 : index
    %38 = vector.load %arg10[%c0_24, %c0_25] : memref<256x896xf32, #tpu.memory_space<vmem>>, vector<256x896xf32>
    %cst_26 = arith.constant dense<0.000000e+00> : vector<8x896xf32>
    %39 = tpu.matmul %37, %38, %cst_26 {dimension_numbers = #tpu.dot_dimension_numbers<[1], [0], [0], [1], [0, 0, 1, 1], [], []>} : vector<8x256xf32>, vector<256x896xf32>, vector<8x896xf32> -> vector<8x896xf32>
    %c0_27 = arith.constant 0 : index
    %c0_28 = arith.constant 0 : index
    %40 = vector.load %arg11[%c0_27, %c0_28] : memref<1x896xf32, #tpu.memory_space<vmem>>, vector<1x896xf32>
    %41 = vector.broadcast %40 : vector<1x896xf32> to vector<8x896xf32>
    %42 = arith.addf %39, %41 : vector<8x896xf32>
    %43 = arith.negf %42 : vector<8x896xf32>
    %44 = math.exp %43 : vector<8x896xf32>
    %cst_29 = arith.constant 1.000000e+00 : f32
    %45 = vector.broadcast %cst_29 : f32 to vector<8x896xf32>
    %46 = arith.addf %45, %44 : vector<8x896xf32>
    %47 = arith.divf %45, %46 : vector<8x896xf32>
    %c0_30 = arith.constant 0 : index
    %c0_31 = arith.constant 0 : index
    %48 = vector.load %arg13[%c0_30, %c0_31] : memref<8x896xf32, #tpu.memory_space<vmem>>, vector<8x896xf32>
    tpu.vector_store %arg13[%c0_30, %c0_31], %47 {strides = array<i32>} : memref<8x896xf32, #tpu.memory_space<vmem>>, vector<8x896xf32>,
    return
  }
  func.func @transform_0(%arg0: i32) -> i32 {
    %c0_i32 = arith.constant 0 : i32
    %c0_i32_0 = arith.constant 0 : i32
    return %c0_i32 : i32
  }
  func.func @transform_1(%arg0: i32) -> (i32, i32) {
    %c0_i32 = arith.constant 0 : i32
    %c0_i32_0 = arith.constant 0 : i32
    return %arg0, %c0_i32 : i32, i32
  }
  func.func @transform_2(%arg0: i32) -> (i32, i32) {
    %c0_i32 = arith.constant 0 : i32
    %c0_i32_0 = arith.constant 0 : i32
    return %arg0, %c0_i32 : i32, i32
  }
  func.func @transform_3(%arg0: i32) -> (i32, i32) {
    %c0_i32 = arith.constant 0 : i32
    %c0_i32_0 = arith.constant 0 : i32
    %c0_i32_1 = arith.constant 0 : i32
    return %c0_i32, %c0_i32_0 : i32, i32
  }
  func.func @transform_4(%arg0: i32) -> (i32, i32) {
    %c0_i32 = arith.constant 0 : i32
    %c0_i32_0 = arith.constant 0 : i32
    %c0_i32_1 = arith.constant 0 : i32
    return %c0_i32, %c0_i32_0 : i32, i32
  }
  func.func @transform_5(%arg0: i32) -> (i32, i32) {
    %c0_i32 = arith.constant 0 : i32
    %c0_i32_0 = arith.constant 0 : i32
    %c0_i32_1 = arith.constant 0 : i32
    return %c0_i32, %c0_i32_0 : i32, i32
  }
  func.func @transform_6(%arg0: i32) -> (i32, i32) {
    %c0_i32 = arith.constant 0 : i32
    %c0_i32_0 = arith.constant 0 : i32
    %c0_i32_1 = arith.constant 0 : i32
    return %c0_i32, %c0_i32_0 : i32, i32
  }
  func.func @transform_7(%arg0: i32) -> (i32, i32) {
    %c0_i32 = arith.constant 0 : i32
    %c0_i32_0 = arith.constant 0 : i32
    %c0_i32_1 = arith.constant 0 : i32
    return %c0_i32, %c0_i32_0 : i32, i32
  }
  func.func @transform_8(%arg0: i32) -> (i32, i32) {
    %c0_i32 = arith.constant 0 : i32
    %c0_i32_0 = arith.constant 0 : i32
    %c0_i32_1 = arith.constant 0 : i32
    return %c0_i32, %c0_i32_0 : i32, i32
  }
  func.func @transform_9(%arg0: i32) -> (i32, i32) {
    %c0_i32 = arith.constant 0 : i32
    %c0_i32_0 = arith.constant 0 : i32
    %c0_i32_1 = arith.constant 0 : i32
    return %c0_i32, %c0_i32_0 : i32, i32
  }
  func.func @transform_10(%arg0: i32) -> (i32, i32) {
    %c0_i32 = arith.constant 0 : i32
    %c0_i32_0 = arith.constant 0 : i32
    %c0_i32_1 = arith.constant 0 : i32
    return %c0_i32, %c0_i32_0 : i32, i32
  }
  func.func @transform_11(%arg0: i32) -> (i32, i32) {
    %c0_i32 = arith.constant 0 : i32
    %c0_i32_0 = arith.constant 0 : i32
    return %arg0, %c0_i32 : i32, i32
  }
  func.func @transform_12(%arg0: i32) -> (i32, i32) {
    %c0_i32 = arith.constant 0 : i32
    %c0_i32_0 = arith.constant 0 : i32
    return %arg0, %c0_i32 : i32, i32
  }
}

</mosaic_0001>

<bundles_post_ra>
// kernel: model_forward.1
= control target key start
LH: loop header
LB: loop body
LE: loop exit
PB: predicated region body
PF: predicated region fallthrough
CT: control target
= control target key end

     0   :  { %19 = vsyncpa [#allocation4], 0  ;;  %s2239_s0 = inlined_call_operand.<no memory space> [shape: f32[1], index: 0, kind: input, shape index: {}]   ;;  %s2240_s1 = inlined_call_operand.vmem [shape: f32[8,784], index: 1, kind: input, shape index: {}]   ;;  %s2241_s2 = inlined_call_operand.vmem [shape: f32[8,32], index: 2, kind: input, shape index: {}]   ;;  %s2242_s3 = inlined_call_operand.hbm [shape: f32[784,256], index: 3, kind: input, shape index: {}]   ;;  %s2243_s4 = inlined_call_operand.vmem [shape: f32[1,256], index: 4, kind: input, shape index: {}]   ;;  %s2244_s5 = inlined_call_operand.vmem [shape: f32[256,32], index: 5, kind: input, shape index: {}]   ;;  %s2245_s6 = inlined_call_operand.vmem [shape: f32[1,32], index: 6, kind: input, shape index: {}]   ;;  %s2246_s7 = inlined_call_operand.vmem [shape: f32[32,256], index: 7, kind: input, shape index: {}]   ;;  %s2247_s8 = inlined_call_operand.vmem [shape: f32[1,256], index: 8, kind: input, shape index: {}]   ;;  %s2248_s9 = inlined_call_operand.hbm [shape: f32[256,896], index: 9, kind: input, shape index: {}]   ;;  %s2249_s10 = inlined_call_operand.vmem [shape: f32[1,896], index: 10, kind: input, shape index: {}]   ;;  %s2250_s11 = inlined_call_operand.vmem [shape: f32[8,64], index: 11, kind: output, shape index: {0}]   ;;  %s2251_s12 = inlined_call_operand.hbm [shape: f32[8,896], index: 12, kind: output, shape index: {1}]  }
   0x1   :  { %20 = vsyncpa [#allocation7], 0 }
   0x2   :  { %21 = vsyncpa [#allocation5], 0  ;;  %s1896_s21 = smov [#allocation3]  }
   0x3   :  { %s33_s22 = sshll.u32 %s1896_s21, 4  ;;  %s34_s22 = int_to_ptr.vmem [resolvable:$true] %s33_s22 }
   0x4   :  { %s1838_s23 = scalar_lea.vmem %s34_s22, 25088  ;;  %p1843_p1 = scmp.lt.s32.totalorder %s34_s22, %s34_s22 }
   0x5   :  { %p1839_p0 = scmp.ne.s32.totalorder %s34_s22, %s1838_s23  ;;  %p1844_p2 = scmp.lt.s32.totalorder %s1838_s23, %s1838_s23 }
   0x7   :  { %p1845_p3 = por %p1844_p2, %p1843_p1 }
   0x9   :  { %p1846_p4 = pnand %p1845_p3, %p1839_p0 }
   0xb   :  { %1849 = shalt.err (!%p1846_p4)
}
   0xc   :  { %s1897_s24 = smov 256   ;;  %s1898_s25 = smov 16  }
   0xd   :  { %39 = dma.hbm_to_vmem [thread:$0]  %s2242_s3, 25088, %s34_s22, [#allocation4], %s1897_s24, %s1897_s24, %s1898_s25  }
   0xe   :  { %s1899_s28 = smov [#allocation6]  }
   0xf   :  { %s55_s29 = sshll.u32 %s1899_s28, 4  ;;  %s56_s29 = int_to_ptr.vmem [resolvable:$true] %s55_s29 }
  0x10   :  { %s1858_s30 = scalar_lea.vmem %s56_s29, 28672  ;;  %p1863_p6 = scmp.lt.s32.totalorder %s56_s29, %s56_s29 }
  0x11   :  { %p1859_p5 = scmp.ne.s32.totalorder %s56_s29, %s1858_s30  ;;  %p1864_p7 = scmp.lt.s32.totalorder %s1858_s30, %s1858_s30 }
  0x13   :  { %p1865_p8 = por %p1864_p7, %p1863_p6 }
  0x15   :  { %p1866_p9 = pnand %p1865_p8, %p1859_p5 }
  0x17   :  { %1869 = shalt.err (!%p1866_p9)
}
  0x18   :  { %s1900_s13 = smov 896   ;;  %s1901_s14 = smov 56  }
  0x19   :  { %61 = dma.hbm_to_vmem [thread:$0]  %s2248_s9, 28672, %s56_s29, [#allocation7], %s1900_s13, %s1900_s13, %s1901_s14  }
  0x1a   :  { %1890 = dma.done.wait [#allocation4], 25088  }
  0x1b   :  { %1891 = vsyncadd [#allocation4], 4294942208 }
  0x1c   :  { %1892 = dma.done.wait [#allocation7], 28672  }
  0x1d   :  { %1893 = vsyncadd [#allocation7], 4294938624  ;;  %v108_v0 = vld [vmem:[#allocation3 + $0xf8] sm:$0xff]  ;;  %v107_v1 = vld [vmem:[#allocation3 + $0xf0] sm:$0xff]  ;;  %vm285_vm0 = vcmask 130048   ;;  %s1903_s19 = smov 104  }
  0x1e   :  { %v106_v2 = vld [vmem:[#allocation3 + $0xe8] sm:$0xff]  ;;  %289 = vmatprep.subr.mxu0 %v108_v0  ;;  %v172_v3 = vld [vmem:[#allocation3 + $0x2f8] sm:$0xff]  ;;  %v105_v4 = vld [vmem:[#allocation3 + $0xe0] sm:$0xff]  ;;  %s1904_s20 = smov 120   ;;  %vm767_vm1 = vcmask 60416   ;;  %vm944_vm2 = vcmask 64512  }
  0x1f   :  { %v171_v5 = vld [vmem:[#allocation3 + $0x2f0] sm:$0xff]  ;;  %290 = vmatpush1.msra.mxu0 %v107_v1  ;;  %360 = vmatprep.subr.mxu1 %v172_v3  ;;  %v104_v6 = vld [vmem:[#allocation3 + $0xd8] sm:$0xff]  ;;  %v170_v7 = vld [vmem:[#allocation3 + $0x2e8] sm:$0xff]  ;;  %vm947_vm3 = vcmask 195584   ;;  %vm949_vm4 = vcmask 261120   ;;  %vm955_vm5 = vcmask 523520  }
  0x20   :  { %291 = vmatprep.subr.mxu0 %v106_v2  ;;  %361 = vmatpush1.msra.mxu1 %v171_v5  ;;  %v103_v8 = vld [vmem:[#allocation3 + $0xd0] sm:$0xff]  ;;  %v169_v9 = vld [vmem:[#allocation3 + $0x2e0] sm:$0xff]  ;;  %v168_v10 = vld [vmem:[#allocation3 + $0x2d8] sm:$0xff] }
  0x21   :  { %292 = vmatpush1.msra.mxu0 %v105_v4  ;;  %362 = vmatprep.subr.mxu1 %v170_v7  ;;  %v102_v11 = vld [vmem:[#allocation3 + $0xc8] sm:$0xff]  ;;  %v167_v12 = vld [vmem:[#allocation3 + $0x2d0] sm:$0xff]  ;;  %v101_v13 = vld [vmem:[#allocation3 + $0xc0] sm:$0xff] }
  0x22   :  { %293 = vmatprep.subr.mxu0 %v104_v6  ;;  %363 = vmatpush1.msra.mxu1 %v169_v9  ;;  %v166_v14 = vld [vmem:[#allocation3 + $0x2c8] sm:$0xff]  ;;  %v100_v15 = vld [vmem:[#allocation3 + $0xb8] sm:$0xff]  ;;  %v165_v16 = vld [vmem:[#allocation3 + $0x2c0] sm:$0xff] }
  0x23   :  { %294 = vmatpush1.msra.mxu0 %v103_v8  ;;  %364 = vmatprep.subr.mxu1 %v168_v10  ;;  %v99_v17 = vld [vmem:[#allocation3 + $0xb0] sm:$0xff]  ;;  %v164_v18 = vld [vmem:[#allocation3 + $0x2b8] sm:$0xff]  ;;  %v98_v19 = vld [vmem:[#allocation3 + $0xa8] sm:$0xff] }
  0x24   :  { %295 = vmatprep.subr.mxu0 %v102_v11  ;;  %365 = vmatpush1.msra.mxu1 %v167_v12  ;;  %v163_v20 = vld [vmem:[#allocation3 + $0x2b0] sm:$0xff]  ;;  %v97_v21 = vld [vmem:[#allocation3 + $0xa0] sm:$0xff]  ;;  %v162_v22 = vld [vmem:[#allocation3 + $0x2a8] sm:$0xff] }
  0x25   :  { %296 = vmatpush1.msra.mxu0 %v101_v13  ;;  %366 = vmatprep.subr.mxu1 %v166_v14  ;;  %v96_v23 = vld [vmem:[#allocation3 + $0x98] sm:$0xff]  ;;  %v161_v24 = vld [vmem:[#allocation3 + $0x2a0] sm:$0xff]  ;;  %v95_v25 = vld [vmem:[#allocation3 + $0x90] sm:$0xff] }
  0x26   :  { %297 = vmatprep.subr.mxu0 %v100_v15  ;;  %367 = vmatpush1.msra.mxu1 %v165_v16  ;;  %v160_v26 = vld [vmem:[#allocation3 + $0x298] sm:$0xff]  ;;  %v94_v27 = vld [vmem:[#allocation3 + $0x88] sm:$0xff]  ;;  %v159_v28 = vld [vmem:[#allocation3 + $0x290] sm:$0xff] }
  0x27   :  { %298 = vmatpush1.msra.mxu0 %v99_v17  ;;  %368 = vmatprep.subr.mxu1 %v164_v18  ;;  %v93_v29 = vld [vmem:[#allocation3 + $0x80] sm:$0xff]  ;;  %v158_v30 = vld [vmem:[#allocation3 + $0x288] sm:$0xff]  ;;  %v92_v31 = vld [vmem:[#allocation3 + $0x78] sm:$0xff] }
  0x28   :  { %299 = vmatprep.subr.mxu0 %v98_v19  ;;  %369 = vmatpush1.msra.mxu1 %v163_v20  ;;  %v157_v32 = vld [vmem:[#allocation3 + $0x280] sm:$0xff]  ;;  %v91_v33 = vld [vmem:[#allocation3 + $0x70] sm:$0xff]  ;;  %v156_v34 = vld [vmem:[#allocation3 + $0x278] sm:$0xff] }
  0x29   :  { %300 = vmatpush1.msra.mxu0 %v97_v21  ;;  %370 = vmatprep.subr.mxu1 %v162_v22  ;;  %v90_v35 = vld [vmem:[#allocation3 + $0x68] sm:$0xff]  ;;  %v155_v36 = vld [vmem:[#allocation3 + $0x270] sm:$0xff]  ;;  %v89_v37 = vld [vmem:[#allocation3 + $0x60] sm:$0xff] }
  0x2a   :  { %301 = vmatprep.subr.mxu0 %v96_v23  ;;  %371 = vmatpush1.msra.mxu1 %v161_v24  ;;  %v154_v38 = vld [vmem:[#allocation3 + $0x268] sm:$0xff]  ;;  %v88_v39 = vld [vmem:[#allocation3 + $0x58] sm:$0xff]  ;;  %v153_v40 = vld [vmem:[#allocation3 + $0x260] sm:$0xff] }
  0x2b   :  { %302 = vmatpush1.msra.mxu0 %v95_v25  ;;  %372 = vmatprep.subr.mxu1 %v160_v26  ;;  %v87_v41 = vld [vmem:[#allocation3 + $0x50] sm:$0xff]  ;;  %v152_v42 = vld [vmem:[#allocation3 + $0x258] sm:$0xff]  ;;  %v86_v43 = vld [vmem:[#allocation3 + $0x48] sm:$0xff] }
  0x2c   :  { %303 = vmatprep.subr.mxu0 %v94_v27  ;;  %373 = vmatpush1.msra.mxu1 %v159_v28  ;;  %v151_v44 = vld [vmem:[#allocation3 + $0x250] sm:$0xff]  ;;  %v85_v45 = vld [vmem:[#allocation3 + $0x40] sm:$0xff]  ;;  %v150_v46 = vld [vmem:[#allocation3 + $0x248] sm:$0xff] }
  0x2d   :  { %304 = vmatpush1.msra.mxu0 %v93_v29  ;;  %374 = vmatprep.subr.mxu1 %v158_v30  ;;  %v84_v47 = vld [vmem:[#allocation3 + $0x38] sm:$0xff]  ;;  %v149_v48 = vld [vmem:[#allocation3 + $0x240] sm:$0xff]  ;;  %v83_v49 = vld [vmem:[#allocation3 + $0x30] sm:$0xff] }
  0x2e   :  { %305 = vmatprep.subr.mxu0 %v92_v31  ;;  %375 = vmatpush1.msra.mxu1 %v157_v32  ;;  %v148_v50 = vld [vmem:[#allocation3 + $0x238] sm:$0xff]  ;;  %v82_v51 = vld [vmem:[#allocation3 + $0x28] sm:$0xff]  ;;  %v147_v52 = vld [vmem:[#allocation3 + $0x230] sm:$0xff] }
  0x2f   :  { %306 = vmatpush1.msra.mxu0 %v91_v33  ;;  %376 = vmatprep.subr.mxu1 %v156_v34  ;;  %v81_v53 = vld [vmem:[#allocation3 + $0x20] sm:$0xff]  ;;  %v146_v54 = vld [vmem:[#allocation3 + $0x228] sm:$0xff]  ;;  %v80_v55 = vld [vmem:[#allocation3 + $0x18] sm:$0xff] }
  0x30   :  { %307 = vmatprep.subr.mxu0 %v90_v35  ;;  %377 = vmatpush1.msra.mxu1 %v155_v36  ;;  %v145_v56 = vld [vmem:[#allocation3 + $0x220] sm:$0xff]  ;;  %v79_v57 = vld [vmem:[#allocation3 + $0x10] sm:$0xff]  ;;  %v144_v58 = vld [vmem:[#allocation3 + $0x218] sm:$0xff] }
  0x31   :  { %308 = vmatpush1.msra.mxu0 %v89_v37  ;;  %378 = vmatprep.subr.mxu1 %v154_v38  ;;  %v78_v59 = vld [vmem:[#allocation3 + $0x8] sm:$0xff]  ;;  %v143_v60 = vld [vmem:[#allocation3 + $0x210] sm:$0xff]  ;;  %v77_v61 = vld [vmem:[#allocation3] sm:$0xff] }
  0x32   :  { %309 = vmatprep.subr.mxu0 %v88_v39  ;;  %379 = vmatpush1.msra.mxu1 %v153_v40  ;;  %v142_v62 = vld [vmem:[#allocation3 + $0x208] sm:$0xff]  ;;  %v140_v63 = vld [vmem:[#allocation3 + $0x1f8] sm:$0xff]  ;;  %v141_v0 = vld [vmem:[#allocation3 + $0x200] sm:$0xff] }
  0x33   :  { %310 = vmatpush1.msra.mxu0 %v87_v41  ;;  %380 = vmatprep.subr.mxu1 %v152_v42  ;;  %v139_v1 = vld [vmem:[#allocation3 + $0x1f0] sm:$0xff]  ;;  %v204_v2 = vld [vmem:[#allocation3 + $0x3f8] sm:$0xff]  ;;  %v138_v3 = vld [vmem:[#allocation3 + $0x1e8] sm:$0xff] }
  0x34   :  { %311 = vmatprep.subr.mxu0 %v86_v43  ;;  %381 = vmatpush1.msra.mxu1 %v151_v44  ;;  %v203_v4 = vld [vmem:[#allocation3 + $0x3f0] sm:$0xff]  ;;  %v137_v5 = vld [vmem:[#allocation3 + $0x1e0] sm:$0xff]  ;;  %v202_v6 = vld [vmem:[#allocation3 + $0x3e8] sm:$0xff] }
  0x35   :  { %312 = vmatpush1.msra.mxu0 %v85_v45  ;;  %382 = vmatprep.subr.mxu1 %v150_v46  ;;  %v136_v7 = vld [vmem:[#allocation3 + $0x1d8] sm:$0xff]  ;;  %v201_v8 = vld [vmem:[#allocation3 + $0x3e0] sm:$0xff]  ;;  %v135_v9 = vld [vmem:[#allocation3 + $0x1d0] sm:$0xff] }
  0x36   :  { %313 = vmatprep.subr.mxu0 %v84_v47  ;;  %383 = vmatpush1.msra.mxu1 %v149_v48  ;;  %v200_v10 = vld [vmem:[#allocation3 + $0x3d8] sm:$0xff]  ;;  %v134_v11 = vld [vmem:[#allocation3 + $0x1c8] sm:$0xff]  ;;  %v199_v12 = vld [vmem:[#allocation3 + $0x3d0] sm:$0xff] }
  0x37   :  { %314 = vmatpush1.msra.mxu0 %v83_v49  ;;  %384 = vmatprep.subr.mxu1 %v148_v50  ;;  %v133_v13 = vld [vmem:[#allocation3 + $0x1c0] sm:$0xff]  ;;  %v198_v14 = vld [vmem:[#allocation3 + $0x3c8] sm:$0xff]  ;;  %v132_v15 = vld [vmem:[#allocation3 + $0x1b8] sm:$0xff] }
  0x38   :  { %315 = vmatprep.subr.mxu0 %v82_v51  ;;  %385 = vmatpush1.msra.mxu1 %v147_v52  ;;  %v197_v16 = vld [vmem:[#allocation3 + $0x3c0] sm:$0xff]  ;;  %v131_v17 = vld [vmem:[#allocation3 + $0x1b0] sm:$0xff]  ;;  %v196_v18 = vld [vmem:[#allocation3 + $0x3b8] sm:$0xff] }
  0x39   :  { %316 = vmatpush1.msra.mxu0 %v81_v53  ;;  %386 = vmatprep.subr.mxu1 %v146_v54  ;;  %v130_v19 = vld [vmem:[#allocation3 + $0x1a8] sm:$0xff]  ;;  %v195_v20 = vld [vmem:[#allocation3 + $0x3b0] sm:$0xff]  ;;  %v129_v21 = vld [vmem:[#allocation3 + $0x1a0] sm:$0xff] }
  0x3a   :  { %317 = vmatprep.subr.mxu0 %v80_v55  ;;  %387 = vmatpush1.msra.mxu1 %v145_v56  ;;  %v194_v22 = vld [vmem:[#allocation3 + $0x3a8] sm:$0xff]  ;;  %v128_v23 = vld [vmem:[#allocation3 + $0x198] sm:$0xff]  ;;  %v193_v24 = vld [vmem:[#allocation3 + $0x3a0] sm:$0xff] }
  0x3b   :  { %318 = vmatpush1.msra.mxu0 %v79_v57  ;;  %388 = vmatprep.subr.mxu1 %v144_v58  ;;  %v127_v25 = vld [vmem:[#allocation3 + $0x190] sm:$0xff]  ;;  %v192_v26 = vld [vmem:[#allocation3 + $0x398] sm:$0xff]  ;;  %v126_v27 = vld [vmem:[#allocation3 + $0x188] sm:$0xff] }
  0x3c   :  { %319 = vmatprep.subr.mxu0 %v78_v59  ;;  %389 = vmatpush1.msra.mxu1 %v143_v60  ;;  %v191_v28 = vld [vmem:[#allocation3 + $0x390] sm:$0xff]  ;;  %v125_v29 = vld [vmem:[#allocation3 + $0x180] sm:$0xff]  ;;  %v190_v30 = vld [vmem:[#allocation3 + $0x388] sm:$0xff] }
  0x3d   :  { %320 = vmatpush1.msra.mxu0 %v77_v61  ;;  %390 = vmatprep.subr.mxu1 %v142_v62  ;;  %v124_v31 = vld [vmem:[#allocation3 + $0x178] sm:$0xff]  ;;  %v189_v32 = vld [vmem:[#allocation3 + $0x380] sm:$0xff]  ;;  %v123_v33 = vld [vmem:[#allocation3 + $0x170] sm:$0xff] }
  0x3e   :  { %321 = vmatprep.subr.mxu0 %v140_v63  ;;  %391 = vmatpush1.msra.mxu1 %v141_v0  ;;  %v188_v34 = vld [vmem:[#allocation3 + $0x378] sm:$0xff]  ;;  %v122_v35 = vld [vmem:[#allocation3 + $0x168] sm:$0xff]  ;;  %v187_v36 = vld [vmem:[#allocation3 + $0x370] sm:$0xff] }
  0x3f   :  { %322 = vmatpush2.msra.mxu0 %v139_v1  ;;  %392 = vmatprep.subr.mxu1 %v204_v2  ;;  %v121_v37 = vld [vmem:[#allocation3 + $0x160] sm:$0xff]  ;;  %v186_v38 = vld [vmem:[#allocation3 + $0x368] sm:$0xff]  ;;  %v120_v39 = vld [vmem:[#allocation3 + $0x158] sm:$0xff] }
  0x40   :  { %323 = vmatprep.subr.mxu0 %v138_v3  ;;  %393 = vmatpush2.msra.mxu1 %v203_v4  ;;  %v185_v40 = vld [vmem:[#allocation3 + $0x360] sm:$0xff]  ;;  %v119_v41 = vld [vmem:[#allocation3 + $0x150] sm:$0xff]  ;;  %v184_v42 = vld [vmem:[#allocation3 + $0x358] sm:$0xff] }
  0x41   :  { %324 = vmatpush2.msra.mxu0 %v137_v5  ;;  %394 = vmatprep.subr.mxu1 %v202_v6  ;;  %v118_v43 = vld [vmem:[#allocation3 + $0x148] sm:$0xff]  ;;  %v183_v44 = vld [vmem:[#allocation3 + $0x350] sm:$0xff]  ;;  %v117_v45 = vld [vmem:[#allocation3 + $0x140] sm:$0xff] }
  0x42   :  { %325 = vmatprep.subr.mxu0 %v136_v7  ;;  %395 = vmatpush2.msra.mxu1 %v201_v8  ;;  %v182_v46 = vld [vmem:[#allocation3 + $0x348] sm:$0xff]  ;;  %v116_v47 = vld [vmem:[#allocation3 + $0x138] sm:$0xff]  ;;  %v181_v48 = vld [vmem:[#allocation3 + $0x340] sm:$0xff] }
  0x43   :  { %326 = vmatpush2.msra.mxu0 %v135_v9  ;;  %396 = vmatprep.subr.mxu1 %v200_v10  ;;  %v115_v49 = vld [vmem:[#allocation3 + $0x130] sm:$0xff]  ;;  %v180_v50 = vld [vmem:[#allocation3 + $0x338] sm:$0xff]  ;;  %v114_v51 = vld [vmem:[#allocation3 + $0x128] sm:$0xff] }
  0x44   :  { %327 = vmatprep.subr.mxu0 %v134_v11  ;;  %397 = vmatpush2.msra.mxu1 %v199_v12  ;;  %v179_v52 = vld [vmem:[#allocation3 + $0x330] sm:$0xff]  ;;  %v113_v53 = vld [vmem:[#allocation3 + $0x120] sm:$0xff]  ;;  %v178_v54 = vld [vmem:[#allocation3 + $0x328] sm:$0xff] }
  0x45   :  { %328 = vmatpush2.msra.mxu0 %v133_v13  ;;  %398 = vmatprep.subr.mxu1 %v198_v14  ;;  %v112_v55 = vld [vmem:[#allocation3 + $0x118] sm:$0xff]  ;;  %v177_v56 = vld [vmem:[#allocation3 + $0x320] sm:$0xff]  ;;  %v111_v57 = vld [vmem:[#allocation3 + $0x110] sm:$0xff] }
  0x46   :  { %329 = vmatprep.subr.mxu0 %v132_v15  ;;  %399 = vmatpush2.msra.mxu1 %v197_v16  ;;  %v176_v58 = vld [vmem:[#allocation3 + $0x318] sm:$0xff]  ;;  %v110_v59 = vld [vmem:[#allocation3 + $0x108] sm:$0xff]  ;;  %v109_v61 = vld [vmem:[#allocation3 + $0x100] sm:$0xff] }
  0x47   :  { %330 = vmatpush2.msra.mxu0 %v131_v17  ;;  %400 = vmatprep.subr.mxu1 %v196_v18  ;;  %v71_v60 = vld [vmem:[%s2240_s1 + $0x8] sm:$0xff]  ;;  %v175_v62 = vld [vmem:[#allocation3 + $0x310] sm:$0xff]  ;;  %v70_v63 = vld [vmem:[%s2240_s1] sm:$0xff] }
  0x48   :  { %331 = vmatprep.subr.mxu0 %v130_v19  ;;  %401 = vmatpush2.msra.mxu1 %v195_v20  ;;  %v174_v0 = vld [vmem:[#allocation3 + $0x308] sm:$0xff]  ;;  %v236_v1 = vld [vmem:[#allocation3 + $0x4f8] sm:$0xff]  ;;  %v173_v2 = vld [vmem:[#allocation3 + $0x300] sm:$0xff] }
  0x49   :  { %332 = vmatpush2.msra.mxu0 %v129_v21  ;;  %402 = vmatprep.subr.mxu1 %v194_v22  ;;  %v73_v3 = vld [vmem:[%s2240_s1 + $0x18] sm:$0xff]  ;;  %v235_v4 = vld [vmem:[#allocation3 + $0x4f0] sm:$0xff]  ;;  %v234_v6 = vld [vmem:[#allocation3 + $0x4e8] sm:$0xff] }
  0x4a   :  { %333 = vmatprep.subr.mxu0 %v128_v23  ;;  %403 = vmatpush2.msra.mxu1 %v193_v24  ;;  %v72_v5 = vld [vmem:[%s2240_s1 + $0x10] sm:$0xff]  ;;  %v233_v7 = vld [vmem:[#allocation3 + $0x4e0] sm:$0xff]  ;;  %v75_v8 = vld [vmem:[%s2240_s1 + $0x28] sm:$0xff] }
  0x4b   :  { %334 = vmatpush2.msra.mxu0 %v127_v25  ;;  %404 = vmatprep.subr.mxu1 %v192_v26  ;;  %v232_v9 = vld [vmem:[#allocation3 + $0x4d8] sm:$0xff]  ;;  %v231_v10 = vld [vmem:[#allocation3 + $0x4d0] sm:$0xff]  ;;  %v230_v11 = vld [vmem:[#allocation3 + $0x4c8] sm:$0xff] }
  0x4c   :  { %335 = vmatprep.subr.mxu0 %v126_v27  ;;  %405 = vmatpush2.msra.mxu1 %v191_v28  ;;  %v229_v12 = vld [vmem:[#allocation3 + $0x4c0] sm:$0xff]  ;;  %v228_v13 = vld [vmem:[#allocation3 + $0x4b8] sm:$0xff]  ;;  %v227_v14 = vld [vmem:[#allocation3 + $0x4b0] sm:$0xff] }
  0x4d   :  { %336 = vmatpush2.msra.mxu0 %v125_v29  ;;  %406 = vmatprep.subr.mxu1 %v190_v30  ;;  %v226_v15 = vld [vmem:[#allocation3 + $0x4a8] sm:$0xff]  ;;  %v225_v16 = vld [vmem:[#allocation3 + $0x4a0] sm:$0xff]  ;;  %v224_v17 = vld [vmem:[#allocation3 + $0x498] sm:$0xff] }
  0x4e   :  { %337 = vmatprep.subr.mxu0 %v124_v31  ;;  %407 = vmatpush2.msra.mxu1 %v189_v32  ;;  %v223_v18 = vld [vmem:[#allocation3 + $0x490] sm:$0xff]  ;;  %v222_v19 = vld [vmem:[#allocation3 + $0x488] sm:$0xff]  ;;  %v221_v20 = vld [vmem:[#allocation3 + $0x480] sm:$0xff] }
  0x4f   :  { %338 = vmatpush2.msra.mxu0 %v123_v33  ;;  %408 = vmatprep.subr.mxu1 %v188_v34  ;;  %v220_v21 = vld [vmem:[#allocation3 + $0x478] sm:$0xff]  ;;  %v219_v22 = vld [vmem:[#allocation3 + $0x470] sm:$0xff]  ;;  %v218_v23 = vld [vmem:[#allocation3 + $0x468] sm:$0xff] }
  0x50   :  { %339 = vmatprep.subr.mxu0 %v122_v35  ;;  %409 = vmatpush2.msra.mxu1 %v187_v36  ;;  %v217_v24 = vld [vmem:[#allocation3 + $0x460] sm:$0xff]  ;;  %v216_v25 = vld [vmem:[#allocation3 + $0x458] sm:$0xff]  ;;  %v215_v26 = vld [vmem:[#allocation3 + $0x450] sm:$0xff] }
  0x51   :  { %340 = vmatpush2.msra.mxu0 %v121_v37  ;;  %410 = vmatprep.subr.mxu1 %v186_v38  ;;  %v214_v27 = vld [vmem:[#allocation3 + $0x448] sm:$0xff]  ;;  %v213_v28 = vld [vmem:[#allocation3 + $0x440] sm:$0xff]  ;;  %v212_v29 = vld [vmem:[#allocation3 + $0x438] sm:$0xff] }
  0x52   :  { %341 = vmatprep.subr.mxu0 %v120_v39  ;;  %411 = vmatpush2.msra.mxu1 %v185_v40  ;;  %v211_v30 = vld [vmem:[#allocation3 + $0x430] sm:$0xff]  ;;  %v210_v31 = vld [vmem:[#allocation3 + $0x428] sm:$0xff]  ;;  %v209_v32 = vld [vmem:[#allocation3 + $0x420] sm:$0xff] }
  0x53   :  { %342 = vmatpush2.msra.mxu0 %v119_v41  ;;  %412 = vmatprep.subr.mxu1 %v184_v42  ;;  %v208_v33 = vld [vmem:[#allocation3 + $0x418] sm:$0xff]  ;;  %v207_v34 = vld [vmem:[#allocation3 + $0x410] sm:$0xff]  ;;  %v206_v35 = vld [vmem:[#allocation3 + $0x408] sm:$0xff] }
  0x54   :  { %343 = vmatprep.subr.mxu0 %v118_v43  ;;  %413 = vmatpush2.msra.mxu1 %v183_v44  ;;  %v205_v36 = vld [vmem:[#allocation3 + $0x400] sm:$0xff]  ;;  %v268_v37 = vld [vmem:[#allocation3 + $0x5f8] sm:$0xff]  ;;  %v267_v38 = vld [vmem:[#allocation3 + $0x5f0] sm:$0xff] }
  0x55   :  { %344 = vmatpush2.msra.mxu0 %v117_v45  ;;  %414 = vmatprep.subr.mxu1 %v182_v46  ;;  %v266_v39 = vld [vmem:[#allocation3 + $0x5e8] sm:$0xff]  ;;  %v265_v40 = vld [vmem:[#allocation3 + $0x5e0] sm:$0xff]  ;;  %v264_v41 = vld [vmem:[#allocation3 + $0x5d8] sm:$0xff] }
  0x56   :  { %345 = vmatprep.subr.mxu0 %v116_v47  ;;  %415 = vmatpush2.msra.mxu1 %v181_v48  ;;  %v263_v42 = vld [vmem:[#allocation3 + $0x5d0] sm:$0xff]  ;;  %v262_v43 = vld [vmem:[#allocation3 + $0x5c8] sm:$0xff]  ;;  %v261_v44 = vld [vmem:[#allocation3 + $0x5c0] sm:$0xff] }
  0x57   :  { %346 = vmatpush2.msra.mxu0 %v115_v49  ;;  %416 = vmatprep.subr.mxu1 %v180_v50  ;;  %v260_v45 = vld [vmem:[#allocation3 + $0x5b8] sm:$0xff]  ;;  %v259_v46 = vld [vmem:[#allocation3 + $0x5b0] sm:$0xff]  ;;  %v258_v47 = vld [vmem:[#allocation3 + $0x5a8] sm:$0xff] }
  0x58   :  { %347 = vmatprep.subr.mxu0 %v114_v51  ;;  %417 = vmatpush2.msra.mxu1 %v179_v52  ;;  %v257_v48 = vld [vmem:[#allocation3 + $0x5a0] sm:$0xff]  ;;  %v256_v49 = vld [vmem:[#allocation3 + $0x598] sm:$0xff]  ;;  %v255_v50 = vld [vmem:[#allocation3 + $0x590] sm:$0xff] }
  0x59   :  { %348 = vmatpush2.msra.mxu0 %v113_v53  ;;  %418 = vmatprep.subr.mxu1 %v178_v54  ;;  %v254_v51 = vld [vmem:[#allocation3 + $0x588] sm:$0xff]  ;;  %v253_v52 = vld [vmem:[#allocation3 + $0x580] sm:$0xff]  ;;  %v252_v53 = vld [vmem:[#allocation3 + $0x578] sm:$0xff] }
  0x5a   :  { %349 = vmatprep.subr.mxu0 %v112_v55  ;;  %419 = vmatpush2.msra.mxu1 %v177_v56  ;;  %v251_v54 = vld [vmem:[#allocation3 + $0x570] sm:$0xff]  ;;  %v250_v55 = vld [vmem:[#allocation3 + $0x568] sm:$0xff]  ;;  %v249_v56 = vld [vmem:[#allocation3 + $0x560] sm:$0xff] }
  0x5b   :  { %350 = vmatpush2.msra.mxu0 %v111_v57  ;;  %420 = vmatprep.subr.mxu1 %v176_v58  ;;  %v248_v57 = vld [vmem:[#allocation3 + $0x558] sm:$0xff]  ;;  %v247_v58 = vld [vmem:[#allocation3 + $0x550] sm:$0xff] }
  0x5c   :  { %351 = vmatprep.subr.mxu0 %v110_v59  ;;  %353 = vmatprep.mubr.f32.mxu0 %v71_v60  ;;  %v246_v59 = vld [vmem:[#allocation3 + $0x548] sm:$0xff]  ;;  %v245_v60 = vld [vmem:[#allocation3 + $0x540] sm:$0xff] }
  0x5d   :  { %352 = vmatpush2.msra.mxu0 %v109_v61  ;;  %421 = vmatpush2.msra.mxu1 %v175_v62  ;;  %v244_v61 = vld [vmem:[#allocation3 + $0x538] sm:$0xff]  ;;  %v243_v62 = vld [vmem:[#allocation3 + $0x530] sm:$0xff] }
  0x5e   :  { %354 = vmatmul.mubr.f32.vlgmr.msra.gmra.mxu0 %v70_v63  ;;  %422 = vmatprep.subr.mxu1 %v174_v0  ;;  %v242_v63 = vld [vmem:[#allocation3 + $0x528] sm:$0xff]  ;;  %v241_v0 = vld [vmem:[#allocation3 + $0x520] sm:$0xff] }
  0x5f   :  { %431 = vmatprep.subr.mxu0 %v236_v1  ;;  %423 = vmatpush2.msra.mxu1 %v173_v2  ;;  %v240_v1 = vld [vmem:[#allocation3 + $0x518] sm:$0xff]  ;;  %v239_v2 = vld [vmem:[#allocation3 + $0x510] sm:$0xff] }
  0x60   :  { %424 = vmatprep.mubr.f32.mxu1 %v73_v3  ;;  %432 = vmatpush1.msra.mxu0 %v235_v4  ;;  %v238_v3 = vld [vmem:[#allocation3 + $0x508] sm:$0xff]  ;;  %v237_v4 = vld [vmem:[#allocation3 + $0x500] sm:$0xff] }
  0x61   :  { %425 = vmatmul.mubr.f32.vlgmr.msra.gmra.mxu1 %v72_v5  ;;  %433 = vmatprep.subr.mxu0 %v234_v6  ;;  %v74_v5 = vld [vmem:[%s2240_s1 + $0x20] sm:$0xff]  ;;  %v272_v6 = vld [vmem:[#allocation3 + $0x618] sm:$0xff] }
  0x62   :  { %434 = vmatpush1.msra.mxu0 %v233_v7  ;;  %495 = vmatprep.mubr.f32.mxu0 %v75_v8  ;;  %v271_v7 = vld [vmem:[#allocation3 + $0x610] sm:$0xff]  ;;  %v270_v8 = vld [vmem:[#allocation3 + $0x608] sm:$0xff] }
  0x63   :  { %435 = vmatprep.subr.mxu0 %v232_v9  ;;  %v269_v9 = vld [vmem:[#allocation3 + $0x600] sm:$0xff] }
  0x64   :  { %436 = vmatpush1.msra.mxu0 %v231_v10  ;;  %v1902_v10 = vmov 0.0  }
  0x65   :  { %437 = vmatprep.subr.mxu0 %v230_v11  ;;  %v76_v11 = vld [vmem:[%s2240_s1 + $0x30] sm:$0xff] }
  0x66   :  { %438 = vmatpush1.msra.mxu0 %v229_v12  ;;  %v606_v12 = vld [vmem:[%s2244_s5 + $0xf8] sm:$0xff] }
  0x67   :  { %439 = vmatprep.subr.mxu0 %v228_v13  ;;  %v590_v13 = vld [vmem:[%s2244_s5 + $0x78] sm:$0xff]  ;;  %1676 = vmatprep.subr.mxu1 %v606_v12  ;;  %v687_v12 = vstv %s2239_s0 }
  0x68   :  { %440 = vmatpush1.msra.mxu0 %v227_v14  ;;  %v605_v14 = vld [vmem:[%s2244_s5 + $0xf0] sm:$0xff]  ;;  %1677 = vmatpush3.msra.mxu1 %v590_v13 }
  0x69   :  { %441 = vmatprep.subr.mxu0 %v226_v15  ;;  %v589_v15 = vld [vmem:[%s2244_s5 + $0x70] sm:$0xff]  ;;  %1678 = vmatprep.subr.mxu1 %v605_v14 }
  0x6a   :  { %442 = vmatpush1.msra.mxu0 %v225_v16  ;;  %v604_v16 = vld [vmem:[%s2244_s5 + $0xe8] sm:$0xff]  ;;  %1679 = vmatpush3.msra.mxu1 %v589_v15  ;;  %v1906_v15 = vmov 1983009808  }
  0x6b   :  { %443 = vmatprep.subr.mxu0 %v224_v17  ;;  %v588_v17 = vld [vmem:[%s2244_s5 + $0x68] sm:$0xff]  ;;  %1680 = vmatprep.subr.mxu1 %v604_v16  ;;  %v702_v16 = vunpack.c.l.s4 %v1906_v15 }
  0x6c   :  { %444 = vmatpush1.msra.mxu0 %v223_v18  ;;  %v603_v18 = vld [vmem:[%s2244_s5 + $0xe0] sm:$0xff]  ;;  %1681 = vmatpush3.msra.mxu1 %v588_v17  ;;  %v1907_v17 = vmov 1934713408  }
  0x6d   :  { %445 = vmatprep.subr.mxu0 %v222_v19  ;;  %v587_v19 = vld [vmem:[%s2244_s5 + $0x60] sm:$0xff]  ;;  %1682 = vmatprep.subr.mxu1 %v603_v18  ;;  %v734_v18 = vunpack.c.l.s4 %v1907_v17 }
  0x6e   :  { %446 = vmatpush1.msra.mxu0 %v221_v20  ;;  %1683 = vmatpush3.msra.mxu1 %v587_v19  ;;  %v602_v20 = vld [vmem:[%s2244_s5 + $0xd8] sm:$0xff]  ;;  %v703_v19 = vunpack.c.0.s8 %v702_v16 }
  0x6f   :  { %447 = vmatprep.subr.mxu0 %v220_v21  ;;  %1684 = vmatprep.subr.mxu1 %v602_v20  ;;  %v586_v21 = vld [vmem:[%s2244_s5 + $0x58] sm:$0xff] }
  0x70   :  { %448 = vmatpush1.msra.mxu0 %v219_v22  ;;  %1685 = vmatpush3.msra.mxu1 %v586_v21  ;;  %v601_v22 = vld [vmem:[%s2244_s5 + $0xd0] sm:$0xff] }
  0x71   :  { %449 = vmatprep.subr.mxu0 %v218_v23  ;;  %1686 = vmatprep.subr.mxu1 %v601_v22  ;;  %v585_v23 = vld [vmem:[%s2244_s5 + $0x50] sm:$0xff]  ;;  %v735_v22 = vunpack.c.0.s8 %v734_v18 }
  0x72   :  { %450 = vmatpush1.msra.mxu0 %v217_v24  ;;  %1687 = vmatpush3.msra.mxu1 %v585_v23  ;;  %v600_v24 = vld [vmem:[%s2244_s5 + $0xc8] sm:$0xff] }
  0x73   :  { %451 = vmatprep.subr.mxu0 %v216_v25  ;;  %1688 = vmatprep.subr.mxu1 %v600_v24  ;;  %v584_v25 = vld [vmem:[%s2244_s5 + $0x48] sm:$0xff] }
  0x74   :  { %452 = vmatpush1.msra.mxu0 %v215_v26  ;;  %1689 = vmatpush3.msra.mxu1 %v584_v25  ;;  %v599_v26 = vld [vmem:[%s2244_s5 + $0xc0] sm:$0xff] }
  0x75   :  { %453 = vmatprep.subr.mxu0 %v214_v27  ;;  %1690 = vmatprep.subr.mxu1 %v599_v26  ;;  %v583_v27 = vld [vmem:[%s2244_s5 + $0x40] sm:$0xff] }
  0x76   :  { %454 = vmatpush1.msra.mxu0 %v213_v28  ;;  %1691 = vmatpush3.msra.mxu1 %v583_v27  ;;  %v598_v28 = vld [vmem:[%s2244_s5 + $0xb8] sm:$0xff] }
  0x77   :  { %455 = vmatprep.subr.mxu0 %v212_v29  ;;  %1692 = vmatprep.subr.mxu1 %v598_v28  ;;  %v582_v29 = vld [vmem:[%s2244_s5 + $0x38] sm:$0xff] }
  0x78   :  { %456 = vmatpush1.msra.mxu0 %v211_v30  ;;  %1693 = vmatpush3.msra.mxu1 %v582_v29  ;;  %v597_v30 = vld [vmem:[%s2244_s5 + $0xb0] sm:$0xff] }
  0x79   :  { %457 = vmatprep.subr.mxu0 %v210_v31  ;;  %v581_v31 = vld [vmem:[%s2244_s5 + $0x30] sm:$0xff]  ;;  %1694 = vmatprep.subr.mxu1 %v597_v30 }
  0x7a   :  { %458 = vmatpush1.msra.mxu0 %v209_v32  ;;  %v596_v32 = vld [vmem:[%s2244_s5 + $0xa8] sm:$0xff]  ;;  %1695 = vmatpush3.msra.mxu1 %v581_v31 }
  0x7b   :  { %459 = vmatprep.subr.mxu0 %v208_v33  ;;  %v580_v33 = vld [vmem:[%s2244_s5 + $0x28] sm:$0xff]  ;;  %1696 = vmatprep.subr.mxu1 %v596_v32 }
  0x7c   :  { %460 = vmatpush1.msra.mxu0 %v207_v34  ;;  %v595_v34 = vld [vmem:[%s2244_s5 + $0xa0] sm:$0xff]  ;;  %1697 = vmatpush3.msra.mxu1 %v580_v33 }
  0x7d   :  { %461 = vmatprep.subr.mxu0 %v206_v35  ;;  %v579_v35 = vld [vmem:[%s2244_s5 + $0x20] sm:$0xff]  ;;  %1698 = vmatprep.subr.mxu1 %v595_v34 }
  0x7e   :  { %462 = vmatpush1.msra.mxu0 %v205_v36  ;;  %v594_v36 = vld [vmem:[%s2244_s5 + $0x98] sm:$0xff]  ;;  %1699 = vmatpush3.msra.mxu1 %v579_v35 }
  0x7f   :  { %463 = vmatprep.subr.mxu0 %v268_v37  ;;  %v578_v37 = vld [vmem:[%s2244_s5 + $0x18] sm:$0xff]  ;;  %1700 = vmatprep.subr.mxu1 %v594_v36 }
  0x80   :  { %464 = vmatpush2.msra.mxu0 %v267_v38  ;;  %v593_v38 = vld [vmem:[%s2244_s5 + $0x90] sm:$0xff]  ;;  %1701 = vmatpush3.msra.mxu1 %v578_v37 }
  0x81   :  { %465 = vmatprep.subr.mxu0 %v266_v39  ;;  %v577_v39 = vld [vmem:[%s2244_s5 + $0x10] sm:$0xff]  ;;  %1702 = vmatprep.subr.mxu1 %v593_v38 }
  0x82   :  { %466 = vmatpush2.msra.mxu0 %v265_v40  ;;  %v592_v40 = vld [vmem:[%s2244_s5 + $0x88] sm:$0xff]  ;;  %1703 = vmatpush3.msra.mxu1 %v577_v39 }
  0x83   :  { %467 = vmatprep.subr.mxu0 %v264_v41  ;;  %v576_v41 = vld [vmem:[%s2244_s5 + $0x8] sm:$0xff]  ;;  %1704 = vmatprep.subr.mxu1 %v592_v40 }
  0x84   :  { %468 = vmatpush2.msra.mxu0 %v263_v42  ;;  %v591_v42 = vld [vmem:[%s2244_s5 + $0x80] sm:$0xff]  ;;  %1705 = vmatpush3.msra.mxu1 %v576_v41 }
  0x85   :  { %469 = vmatprep.subr.mxu0 %v262_v43  ;;  %v575_v43 = vld [vmem:[%s2244_s5] sm:$0xff]  ;;  %1706 = vmatprep.subr.mxu1 %v591_v42  ;;  %s1910_s5 = smov 32  }
  0x86   :  { %470 = vmatpush2.msra.mxu0 %v261_v44  ;;  %1707 = vmatpush3.msra.mxu1 %v575_v43  ;;  %v275_v44 = vlaneseq }
  0x87   :  { %471 = vmatprep.subr.mxu0 %v260_v45 }
  0x88   :  { %472 = vmatpush2.msra.mxu0 %v259_v46  ;;  %v2103_v45 = vshrl.u32 %v275_v44, 7 }
  0x89   :  { %473 = vmatprep.subr.mxu0 %v258_v47  ;;  %v273_v47 = vld [vmem:[%s2243_s4] sm:$0x3]  ;;  %s1909_s4 = smov 24  }
  0x8a   :  { %474 = vmatpush2.msra.mxu0 %v257_v48  ;;  %v2106_v46 = vsub.s32 0, %v2103_v45  ;;  %v2112_v48 = vsub.s32 1, %v2103_v45  ;;  %v2130_v23 = vsub.s32 %v703_v19, %v2103_v45  ;;  %v2133_v29 = vsub.s32 %v735_v22, %v2103_v45 }
  0x8b   :  { %475 = vmatprep.subr.mxu0 %v256_v49 }
  0x8c   :  { %476 = vmatpush2.msra.mxu0 %v255_v50  ;;  %v278_v50 = vrot.slane %v273_v47, %v2106_v46 }
  0x8d   :  { %477 = vmatprep.subr.mxu0 %v254_v51  ;;  %v282_v51 = vrot.slane %v273_v47, %v2112_v48 }
  0x8e   :  { %478 = vmatpush2.msra.mxu0 %v253_v52 }
  0x8f   :  { %479 = vmatprep.subr.mxu0 %v252_v53 }
  0x90   :  { %480 = vmatpush2.msra.mxu0 %v251_v54 }
  0x91   :  { %481 = vmatprep.subr.mxu0 %v250_v55 }
  0x92   :  { %482 = vmatpush2.msra.mxu0 %v249_v56 }
  0x93   :  { %483 = vmatprep.subr.mxu0 %v248_v57 }
  0x94   :  { %484 = vmatpush2.msra.mxu0 %v247_v58 }
  0x95   :  { %485 = vmatprep.subr.mxu0 %v246_v59 }
  0x96   :  { %486 = vmatpush2.msra.mxu0 %v245_v60 }
  0x97   :  { %487 = vmatprep.subr.mxu0 %v244_v61 }
  0x98   :  { %488 = vmatpush2.msra.mxu0 %v243_v62 }
  0x99   :  { %489 = vmatprep.subr.mxu0 %v242_v63 }
  0x9a   :  { %490 = vmatpush2.msra.mxu0 %v241_v0 }
  0x9b   :  { %491 = vmatprep.subr.mxu0 %v240_v1 }
  0x9c   :  { %492 = vmatpush2.msra.mxu0 %v239_v2 }
  0x9d   :  { %493 = vmatprep.subr.mxu0 %v238_v3 }
  0x9e   :  { %494 = vmatpush2.msra.mxu0 %v237_v4 }
  0x9f   :  { %496 = vmatmul.mubr.f32.vlgmr.msra.gmra.mxu0 %v74_v5  ;;  %530 = vmatprep.subr.mxu0 %v272_v6  ;;  %v1667_v6 = vld [vmem:[%s2245_s6] ss:$0 sm:$0xff]  ;;  %s1905_s6 = smov 112  }
  0xa0   :  { %531 = vmatpush1.msra.mxu0 %v271_v7  ;;  %566 = vmatprep.mubr.f32.mxu0 %v1902_v10 }
  0xa1   :  { %532 = vmatprep.subr.mxu0 %v270_v8 }
  0xa2   :  { %533 = vmatpush1.msra.mxu0 %v269_v9  ;;  %v685_v9 = vld [vmem:[%s2241_s2] sm:$0xff] }
  0xa3   :  { %1666 = vmatmul.mubr.msk.f32.vlgmr.msra.gmra.mxu0 %vm285_vm0, %v76_v11 }
 0x11e   :  { %v355_v49 = vpop.f32.mrf.mxu0 }
 0x11f   :  { %v356_v54 = vadd.f32 %v355_v49, %v278_v50 }
 0x120   :  { %v357_v52 = vpop.f32.mrf.mxu0 }
 0x121   :  { %v426_v53 = vpop.f32.mrf.mxu1  ;;  %v358_v55 = vadd.f32 %v357_v52, %v282_v51 }
 0x122   :  { %v427_v58 = vadd.f32 %v426_v53, %v356_v54 }
 0x123   :  { %v428_v56 = vpop.f32.mrf.mxu1 }
 0x124   :  { %v429_v60 = vadd.f32 %v428_v56, %v358_v55 }
 0x15f   :  { %v497_v57 = vpop.f32.mrf.mxu0 }
 0x160   :  { %v498_v61 = vadd.f32 %v497_v57, %v427_v58 }
 0x161   :  { %v499_v59 = vpop.f32.mrf.mxu0 }
 0x162   :  { %v500_v63 = vadd.f32 %v499_v59, %v429_v60 }
 0x163   :  { %v568_v62 = vpop.f32.mrf.mxu0 }
 0x164   :  { %v569_v0 = vadd.f32 %v568_v62, %v498_v61 }
 0x165   :  { %v570_v1 = vpop.f32.mrf.mxu0 }
 0x166   :  { %v571_v2 = vadd.f32 %v570_v1, %v500_v63 }
 0x168   :  { %1762 = vtanh.f32 %v571_v2 }
 0x169   :  { %1764 = vtanh.f32 %v569_v0 }
 0x175   :  { %v1763_v3 = vpop.eup %1762 }
 0x176   :  { %v1765_v4 = vpop.eup %1764  ;;  %678 = vmatprep.mubr.f32.mxu1 %v1763_v3 }
 0x177   :  { %679 = vmatmul.mubr.f32.vlgmr.msra.gmra.mxu1 %v1765_v4 }
 0x178   :  { %1044 = vmatprep.mubr.f32.mxu1 %v1902_v10 }
 0x237   :  { %v1708_v5 = vpop.f32.mrf.mxu1 }
 0x239   :  { %v1709_v7 = vpop.f32.mrf.mxu1 }
 0x23a   :  { %v1710_v8 = vadd.f32 %v1709_v7, %v1708_v5 }
 0x23c   :  { %v2123_v11 = vadd.f32 %v1710_v8, %v1667_v6 }
 0x23e   :  { %v686_v13 = vadd.f32 %v685_v9, %v2123_v11 }
 0x240   :  { %v688_v14 = vmul.f32 %v687_v12, %v686_v13 }
 0x242   :  { %696 = vrot.lane.b32.xlu1 %v688_v14, %s1903_s19  ;;  %690 = vrot.lane.b32.xlu0 %v688_v14, %s1904_s20 }
 0x246   :  { %693 = vrot.lane.b32.xlu0 %v688_v14, %s1905_s6 }
 0x2b4   :  { %v697_v20 = vpop.permute.xlu1 %696  ;;  %v691_v21 = vpop.permute.xlu0 %690 }
 0x2b5   :  { %v715_v24 = vcombine.low %v691_v21, %v697_v20  ;;  %v716_v25 = vcombine.high %v691_v21, %v697_v20 }
 0x2b7   :  { %v723_v30 = vrot.slane %v715_v24, %v2130_v23  ;;  %v730_v31 = vrot.slane %v716_v25, %v2130_v23 }
 0x2b8   :  { %v694_v26 = vpop.permute.xlu0 %693 }
 0x2b9   :  { %v699_v27 = vcombine.low %v688_v14, %v694_v26  ;;  %v700_v28 = vcombine.high %v688_v14, %v694_v26 }
 0x2bb   :  { %v707_v32 = vrot.slane %v699_v27, %v2130_v23  ;;  %v714_v33 = vrot.slane %v700_v28, %v2130_v23 }
 0x2bd   :  { %v731_v34 = vcombine.low %v707_v32, %v723_v30  ;;  %v732_v35 = vcombine.high %v707_v32, %v723_v30  ;;  %v747_v36 = vcombine.low %v714_v33, %v730_v31  ;;  %v748_v39 = vcombine.high %v714_v33, %v730_v31 }
 0x2bf   :  { %v746_v37 = vrot.slane %v732_v35, %v2133_v29  ;;  %v739_v38 = vrot.slane %v731_v34, %v2133_v29  ;;  %v755_v42 = vrot.slane %v747_v36, %v2133_v29  ;;  %v762_v44 = vrot.slane %v748_v39, %v2133_v29  ;;  %v964_v36 = vld [vmem:[%s2246_s7 + $0x38] sm:$0xff] }
 0x2c0   :  { %1004 = vmatprep.subr.mxu1 %v964_v36  ;;  %v1139_v36 = vld [vmem:[#allocation6 + $0x2b0] sm:$0xff] }
 0x2c1   :  { %v774_v40 = vsel %vm767_vm1, %v746_v37, -inf  ;;  %v768_v41 = vsel %vm767_vm1, %v739_v38, -inf  ;;  %v764_v43 = vcombine.high %v746_v37, %v1902_v10  ;;  %v780_v47 = vsel %vm767_vm1, %v755_v42, -inf }
 0x2c2   :  { %775 = vmax.xlane.f32.xlu0 %v774_v40  ;;  %769 = vmax.xlane.f32.xlu1 %v768_v41  ;;  %v765_v50 = vcombine.high %v755_v42, %v1902_v10  ;;  %v763_v51 = vcombine.high %v739_v38, %v1902_v10  ;;  %v766_v54 = vcombine.high %v762_v44, %v1902_v10  ;;  %v786_v56 = vsel %vm767_vm1, %v762_v44, -inf }
 0x2c3   :  { %v777_v49 = vsel %vm767_vm1, %v764_v43, -inf }
 0x2c4   :  { %v783_v52 = vsel %vm767_vm1, %v765_v50, -inf  ;;  %v771_v53 = vsel %vm767_vm1, %v763_v51, -inf  ;;  %v789_v55 = vsel %vm767_vm1, %v766_v54, -inf }
 0x2c6   :  { %781 = vmax.xlane.f32.xlu0 %v780_v47  ;;  %778 = vmax.xlane.f32.xlu1 %v777_v49 }
 0x2ca   :  { %784 = vmax.xlane.f32.xlu1 %v783_v52  ;;  %772 = vmax.xlane.f32.xlu0 %v771_v53 }
 0x2ce   :  { %790 = vmax.xlane.f32.xlu1 %v789_v55  ;;  %787 = vmax.xlane.f32.xlu0 %v786_v56 }
 0x34b   :  { %v776_v57 = vpop.xlane.xlu0 %775  ;;  %v770_v58 = vpop.xlane.xlu1 %769 }
 0x34c   :  { %v794_v59 = vsub.f32 %v746_v37, %v776_v57  ;;  %v792_v60 = vsub.f32 %v739_v38, %v770_v58  ;;  %v963_v37 = vld [vmem:[%s2246_s7 + $0x30] sm:$0xff]  ;;  %v962_v38 = vld [vmem:[%s2246_s7 + $0x28] sm:$0xff] }
 0x34d   :  { %1005 = vmatpush1.msra.mxu1 %v963_v37 }
 0x34e   :  { %v800_v61 = vmul.f32 1.442695, %v792_v60  ;;  %v804_v62 = vmul.f32 1.442695, %v794_v59  ;;  %1006 = vmatprep.subr.mxu1 %v962_v38  ;;  %v1132_v38 = vld [vmem:[#allocation6 + $0x278] sm:$0xff] }
 0x34f   :  { %v782_v63 = vpop.xlane.xlu0 %781  ;;  %v779_v0 = vpop.xlane.xlu1 %778 }
 0x350   :  { %v796_v1 = vsub.f32 %v755_v42, %v782_v63  ;;  %1766 = vpow2.f32 %v800_v61  ;;  %v795_v2 = vsub.f32 %v764_v43, %v779_v0 }
 0x351   :  { %1768 = vpow2.f32 %v804_v62 }
 0x352   :  { %v808_v10 = vmul.f32 1.442695, %v796_v1  ;;  %v806_v7 = vmul.f32 1.442695, %v795_v2  ;;  %v960_v2 = vld [vmem:[%s2246_s7 + $0x18] sm:$0xff] }
 0x353   :  { %v785_v3 = vpop.xlane.xlu1 %784  ;;  %v773_v4 = vpop.xlane.xlu0 %772 }
 0x354   :  { %v793_v5 = vsub.f32 %v763_v51, %v773_v4  ;;  %1770 = vpow2.f32 %v808_v10  ;;  %v797_v8 = vsub.f32 %v765_v50, %v785_v3  ;;  %v961_v10 = vld [vmem:[%s2246_s7 + $0x20] sm:$0xff]  ;;  %v959_v3 = vld [vmem:[%s2246_s7 + $0x10] sm:$0xff] }
 0x355   :  { %1007 = vmatpush1.msra.mxu1 %v961_v10  ;;  %v1265_v10 = vld [vmem:[#allocation6 + $0x6a0] sm:$0xff] }
 0x356   :  { %v802_v6 = vmul.f32 1.442695, %v793_v5  ;;  %v810_v15 = vmul.f32 1.442695, %v797_v8  ;;  %v958_v8 = vld [vmem:[%s2246_s7 + $0x8] sm:$0xff]  ;;  %1008 = vmatprep.subr.mxu1 %v960_v2  ;;  %v1259_v2 = vld [vmem:[#allocation6 + $0x670] sm:$0xff] }
 0x357   :  { %v788_v9 = vpop.xlane.xlu0 %787  ;;  %v791_v12 = vpop.xlane.xlu1 %790  ;;  %1009 = vmatpush1.msra.mxu1 %v959_v3  ;;  %v1258_v3 = vld [vmem:[#allocation6 + $0x668] sm:$0xff] }
 0x358   :  { %v798_v13 = vsub.f32 %v762_v44, %v788_v9  ;;  %1772 = vpow2.f32 %v802_v6  ;;  %v799_v16 = vsub.f32 %v766_v54, %v791_v12  ;;  %1010 = vmatprep.subr.mxu1 %v958_v8  ;;  %v1238_v8 = vld [vmem:[#allocation6 + $0x5c8] sm:$0xff] }
 0x359   :  { %1774 = vpow2.f32 %v806_v7 }
 0x35a   :  { %v812_v14 = vmul.f32 1.442695, %v798_v13  ;;  %v814_v18 = vmul.f32 1.442695, %v799_v16  ;;  %v957_v13 = vld [vmem:[%s2246_s7] sm:$0xff]  ;;  %s1908_s7 = smov 8  }
 0x35b   :  { %1011 = vmatpush1.msra.mxu1 %v957_v13 }
 0x35c   :  { %1776 = vpow2.f32 %v812_v14 }
 0x35d   :  { %v1767_v17 = vpop.eup %1766  ;;  %1778 = vpow2.f32 %v810_v15 }
 0x35e   :  { %v816_v19 = vsel %vm767_vm1, %v1767_v17, 0.0  ;;  %v1769_v20 = vpop.eup %1768  ;;  %1780 = vpow2.f32 %v814_v18  ;;  %v1159_v18 = vld [vmem:[#allocation6 + $0x350] sm:$0xff] }
 0x35f   :  { %817 = vadd.xlane.f32.xlu0 %v816_v19  ;;  %v822_v21 = vsel %vm767_vm1, %v1769_v20, 0.0  ;;  %v1161_v19 = vld [vmem:[#allocation6 + $0x360] sm:$0xff]  ;;  %1314 = vmatprep.subr.mxu1 %v1159_v18  ;;  %v1158_v18 = vld [vmem:[#allocation6 + $0x348] sm:$0xff] }
 0x360   :  { %1385 = vmatprep.subr.mxu0 %v1161_v19 }
 0x361   :  { %v1771_v22 = vpop.eup %1770 }
 0x362   :  { %v828_v25 = vsel %vm767_vm1, %v1771_v22, 0.0 }
 0x363   :  { %823 = vadd.xlane.f32.xlu0 %v822_v21 }
 0x365   :  { %v1773_v24 = vpop.eup %1772 }
 0x366   :  { %v819_v26 = vsel %vm767_vm1, %v1773_v24, 0.0  ;;  %v1775_v27 = vpop.eup %1774 }
 0x367   :  { %829 = vadd.xlane.f32.xlu0 %v828_v25  ;;  %820 = vadd.xlane.f32.xlu1 %v819_v26  ;;  %v825_v30 = vsel %vm767_vm1, %v1775_v27, 0.0  ;;  %v1153_v25 = vld [vmem:[#allocation6 + $0x320] sm:$0xff] }
 0x369   :  { %v1777_v28 = vpop.eup %1776 }
 0x36a   :  { %v834_v31 = vsel %vm767_vm1, %v1777_v28, 0.0  ;;  %v1779_v32 = vpop.eup %1778 }
 0x36b   :  { %826 = vadd.xlane.f32.xlu1 %v825_v30  ;;  %835 = vadd.xlane.f32.xlu0 %v834_v31  ;;  %v831_v33 = vsel %vm767_vm1, %v1779_v32, 0.0  ;;  %v1781_v34 = vpop.eup %1780  ;;  %v1147_v30 = vld [vmem:[#allocation6 + $0x2f0] sm:$0xff]  ;;  %v1146_v31 = vld [vmem:[#allocation6 + $0x2e8] sm:$0xff] }
 0x36c   :  { %v837_v35 = vsel %vm767_vm1, %v1781_v34, 0.0 }
 0x36f   :  { %832 = vadd.xlane.f32.xlu1 %v831_v33 }
 0x373   :  { %838 = vadd.xlane.f32.xlu1 %v837_v35  ;;  %v1140_v35 = vld [vmem:[#allocation6 + $0x2b8] sm:$0xff] }
 0x3e8   :  { %v818_v39 = vpop.xlane.xlu0 %817 }
 0x3ec   :  { %v824_v40 = vpop.xlane.xlu0 %823 }
 0x3ed   :  { %1782 = vrcp.f32 %v824_v40  ;;  %v1125_v40 = vld [vmem:[#allocation6 + $0x240] sm:$0xff] }
 0x3f0   :  { %v821_v41 = vpop.xlane.xlu1 %820  ;;  %v830_v42 = vpop.xlane.xlu0 %829 }
 0x3f1   :  { %1784 = vrcp.f32 %v821_v41  ;;  %v1119_v41 = vld [vmem:[#allocation6 + $0x210] sm:$0xff] }
 0x3f4   :  { %v827_v43 = vpop.xlane.xlu1 %826  ;;  %v836_v44 = vpop.xlane.xlu0 %835 }
 0x3f5   :  { %1786 = vrcp.f32 %v827_v43  ;;  %v1112_v43 = vld [vmem:[#allocation6 + $0x1d8] sm:$0xff] }
 0x3f6   :  { %1788 = vrcp.f32 %v818_v39  ;;  %v1126_v39 = vld [vmem:[#allocation6 + $0x248] sm:$0xff] }
 0x3f7   :  { %1790 = vrcp.f32 %v836_v44  ;;  %v1111_v44 = vld [vmem:[#allocation6 + $0x1d0] sm:$0xff] }
 0x3f8   :  { %v833_v47 = vpop.xlane.xlu1 %832  ;;  %1792 = vrcp.f32 %v830_v42  ;;  %v1118_v42 = vld [vmem:[#allocation6 + $0x208] sm:$0xff] }
 0x3f9   :  { %1794 = vrcp.f32 %v833_v47  ;;  %v1105_v47 = vld [vmem:[#allocation6 + $0x1a0] sm:$0xff] }
 0x3fa   :  { %v1783_v50 = vpop.eup %1782 }
 0x3fb   :  { %v858_v57 = vmul.f32 %v1783_v50, %v1769_v20  ;;  %v1098_v50 = vld [vmem:[#allocation6 + $0x168] sm:$0xff] }
 0x3fc   :  { %v839_v49 = vpop.xlane.xlu1 %838 }
 0x3fd   :  { %1796 = vrcp.f32 %v839_v49  ;;  %v1104_v49 = vld [vmem:[#allocation6 + $0x198] sm:$0xff] }
 0x3fe   :  { %v1785_v51 = vpop.eup %1784 }
 0x3ff   :  { %v857_v56 = vmul.f32 %v1785_v51, %v1773_v24  ;;  %v1154_v24 = vld [vmem:[#allocation6 + $0x328] sm:$0xff]  ;;  %v1097_v51 = vld [vmem:[#allocation6 + $0x160] sm:$0xff] }
 0x402   :  { %v1787_v52 = vpop.eup %1786 }
 0x403   :  { %v1789_v53 = vpop.eup %1788  ;;  %v859_v54 = vmul.f32 %v1787_v52, %v1775_v27  ;;  %v1091_v52 = vld [vmem:[#allocation6 + $0x130] sm:$0xff] }
 0x404   :  { %v1791_v55 = vpop.eup %1790  ;;  %v856_v59 = vmul.f32 %v1789_v53, %v1767_v17  ;;  %v1084_v53 = vld [vmem:[#allocation6 + $0xf8] sm:$0xff] }
 0x405   :  { %v1793_v58 = vpop.eup %1792  ;;  %v862_v60 = vmul.f32 %v1791_v55, %v1777_v28  ;;  %v872_v61 = vcombine.low %v857_v56, %v859_v54  ;;  %v1083_v54 = vld [vmem:[#allocation6 + $0xf0] sm:$0xff]  ;;  %v1077_v55 = vld [vmem:[#allocation6 + $0xc0] sm:$0xff]  ;;  %v1076_v56 = vld [vmem:[#allocation6 + $0xb8] sm:$0xff] }
 0x406   :  { %v1795_v62 = vpop.eup %1794  ;;  %v860_v63 = vmul.f32 %v1793_v58, %v1771_v22  ;;  %v864_v0 = vcombine.low %v856_v59, %v858_v57  ;;  %v1160_v22 = vld [vmem:[#allocation6 + $0x358] sm:$0xff]  ;;  %v1070_v57 = vld [vmem:[#allocation6 + $0x88] sm:$0xff]  ;;  %v1069_v58 = vld [vmem:[#allocation6 + $0x80] sm:$0xff] }
 0x407   :  { %v861_v4 = vmul.f32 %v1795_v62, %v1779_v32  ;;  %v879_v6 = vrot.slane %v872_v61, %v2130_v23  ;;  %1386 = vmatpush1.msra.mxu0 %v1160_v22  ;;  %v1063_v59 = vld [vmem:[#allocation6 + $0x50] sm:$0xff]  ;;  %v1056_v61 = vld [vmem:[#allocation6 + $0x18] sm:$0xff] }
 0x408   :  { %v880_v7 = vcombine.low %v860_v63, %v862_v60  ;;  %v871_v9 = vrot.slane %v864_v0, %v2130_v23  ;;  %1387 = vmatprep.subr.mxu0 %v1154_v24  ;;  %v1062_v60 = vld [vmem:[#allocation6 + $0x48] sm:$0xff]  ;;  %v1055_v62 = vld [vmem:[#allocation6 + $0x10] sm:$0xff]  ;;  %v1273_v63 = vld [vmem:[#allocation6 + $0x6e0] sm:$0xff] }
 0x409   :  { %1388 = vmatpush1.msra.mxu0 %v1153_v25  ;;  %v1272_v0 = vld [vmem:[#allocation6 + $0x6d8] sm:$0xff]  ;;  %v1151_v22 = vld [vmem:[#allocation6 + $0x310] sm:$0xff]  ;;  %v1145_v24 = vld [vmem:[#allocation6 + $0x2e0] sm:$0xff] }
 0x40a   :  { %v1797_v1 = vpop.eup %1796  ;;  %v887_v14 = vrot.slane %v880_v7, %v2130_v23  ;;  %v897_v16 = vcombine.high %v871_v9, %v879_v6  ;;  %v896_v17 = vcombine.low %v871_v9, %v879_v6  ;;  %1389 = vmatprep.subr.mxu0 %v1147_v30  ;;  %v1245_v6 = vld [vmem:[#allocation6 + $0x600] sm:$0xff]  ;;  %v1244_v7 = vld [vmem:[#allocation6 + $0x5f8] sm:$0xff] }
 0x40b   :  { %v863_v5 = vmul.f32 %v1797_v1, %v1781_v34  ;;  %1390 = vmatpush1.msra.mxu0 %v1146_v31  ;;  %v1266_v1 = vld [vmem:[#allocation6 + $0x6a8] sm:$0xff]  ;;  %v1237_v9 = vld [vmem:[#allocation6 + $0x5c0] sm:$0xff]  ;;  %v1144_v25 = vld [vmem:[#allocation6 + $0x2d8] sm:$0xff] }
 0x40c   :  { %v911_v26 = vrot.slane %v897_v16, %v2133_v29  ;;  %v2194_v28 = vrot.slane %v896_v17, %v2133_v29  ;;  %1391 = vmatprep.subr.mxu0 %v1140_v35  ;;  %v1124_v30 = vld [vmem:[#allocation6 + $0x238] sm:$0xff]  ;;  %v1123_v31 = vld [vmem:[#allocation6 + $0x230] sm:$0xff]  ;;  %v1109_v35 = vld [vmem:[#allocation6 + $0x1c0] sm:$0xff] }
 0x40d   :  { %v888_v12 = vcombine.low %v861_v4, %v863_v5  ;;  %1392 = vmatpush1.msra.mxu0 %v1139_v36  ;;  %v1252_v4 = vld [vmem:[#allocation6 + $0x638] sm:$0xff]  ;;  %v1251_v5 = vld [vmem:[#allocation6 + $0x630] sm:$0xff] }
 0x40e   :  { %v1103_v36 = vld [vmem:[#allocation6 + $0x190] sm:$0xff] }
 0x40f   :  { %v895_v15 = vrot.slane %v888_v12, %v2130_v23  ;;  %v1231_v12 = vld [vmem:[#allocation6 + $0x590] sm:$0xff] }
 0x411   :  { %v913_v20 = vcombine.high %v887_v14, %v895_v15  ;;  %v912_v21 = vcombine.low %v887_v14, %v895_v15 }
 0x413   :  { %v927_v27 = vrot.slane %v913_v20, %v2133_v29  ;;  %v2197_v23 = vrot.slane %v912_v21, %v2133_v29  ;;  %v1133_v29 = vld [vmem:[#allocation6 + $0x280] sm:$0xff]  ;;  %v1152_v20 = vld [vmem:[#allocation6 + $0x318] sm:$0xff] }
 0x414   :  { %1393 = vmatprep.subr.mxu0 %v1133_v29  ;;  %v1102_v29 = vld [vmem:[#allocation6 + $0x188] sm:$0xff] }
 0x415   :  { %v930_v32 = vcombine.low %v911_v26, %v927_v27  ;;  %v929_v33 = vcombine.high %v2194_v28, %v2197_v23  ;;  %v928_v34 = vcombine.low %v2194_v28, %v2197_v23  ;;  %v931_v37 = vcombine.high %v911_v26, %v927_v27  ;;  %1394 = vmatpush1.msra.mxu0 %v1132_v38  ;;  %v1138_v26 = vld [vmem:[#allocation6 + $0x2a8] sm:$0xff]  ;;  %v1137_v27 = vld [vmem:[#allocation6 + $0x2a0] sm:$0xff]  ;;  %v1131_v28 = vld [vmem:[#allocation6 + $0x270] sm:$0xff] }
 0x416   :  { %1395 = vmatprep.subr.mxu0 %v1126_v39  ;;  %v1130_v23 = vld [vmem:[#allocation6 + $0x268] sm:$0xff]  ;;  %v1095_v38 = vld [vmem:[#allocation6 + $0x150] sm:$0xff]  ;;  %v1089_v39 = vld [vmem:[#allocation6 + $0x120] sm:$0xff] }
 0x417   :  { %937 = vrot.lane.b32.xlu1 %v930_v32, %s1898_s25  ;;  %933 = vrot.lane.b32.xlu0 %v929_v33, %s1908_s7  ;;  %v1117_v32 = vld [vmem:[#allocation6 + $0x200] sm:$0xff]  ;;  %v1116_v33 = vld [vmem:[#allocation6 + $0x1f8] sm:$0xff] }
 0x418   :  { %1396 = vmatpush1.msra.mxu0 %v1125_v40  ;;  %v1088_v40 = vld [vmem:[#allocation6 + $0x118] sm:$0xff] }
 0x419   :  { %1397 = vmatprep.subr.mxu0 %v1119_v41  ;;  %v1082_v41 = vld [vmem:[#allocation6 + $0xe8] sm:$0xff] }
 0x41a   :  { %1398 = vmatpush1.msra.mxu0 %v1118_v42  ;;  %v1081_v42 = vld [vmem:[#allocation6 + $0xe0] sm:$0xff] }
 0x41b   :  { %941 = vrot.lane.b32.xlu1 %v931_v37, %s1909_s4  ;;  %952 = vrot.lane.b32.xlu0 %v2123_v11, %s1910_s5  ;;  %v1090_v11 = vld [vmem:[#allocation6 + $0x128] sm:$0xff]  ;;  %v1096_v37 = vld [vmem:[#allocation6 + $0x158] sm:$0xff] }
 0x41c   :  { %1399 = vmatprep.subr.mxu0 %v1112_v43  ;;  %v1075_v43 = vld [vmem:[#allocation6 + $0xb0] sm:$0xff] }
 0x41d   :  { %1400 = vmatpush1.msra.mxu0 %v1111_v44  ;;  %v1074_v44 = vld [vmem:[#allocation6 + $0xa8] sm:$0xff] }
 0x41e   :  { %1401 = vmatprep.subr.mxu0 %v1105_v47  ;;  %v1068_v47 = vld [vmem:[#allocation6 + $0x78] sm:$0xff] }
 0x41f   :  { %1402 = vmatpush1.msra.mxu0 %v1104_v49  ;;  %v1067_v49 = vld [vmem:[#allocation6 + $0x70] sm:$0xff] }
 0x420   :  { %1403 = vmatprep.subr.mxu0 %v1098_v50  ;;  %v1061_v50 = vld [vmem:[#allocation6 + $0x40] sm:$0xff] }
 0x421   :  { %1404 = vmatpush1.msra.mxu0 %v1097_v51  ;;  %v1060_v51 = vld [vmem:[#allocation6 + $0x38] sm:$0xff] }
 0x422   :  { %1405 = vmatprep.subr.mxu0 %v1091_v52  ;;  %v1054_v52 = vld [vmem:[#allocation6 + $0x8] sm:$0xff] }
 0x423   :  { %1406 = vmatpush1.msra.mxu0 %v1090_v11  ;;  %v1053_v11 = vld [vmem:[#allocation6] sm:$0xff] }
 0x424   :  { %1407 = vmatprep.subr.mxu0 %v1084_v53  ;;  %v1271_v53 = vld [vmem:[#allocation6 + $0x6d0] sm:$0xff] }
 0x425   :  { %1408 = vmatpush1.msra.mxu0 %v1083_v54  ;;  %v1270_v54 = vld [vmem:[#allocation6 + $0x6c8] sm:$0xff] }
 0x426   :  { %1409 = vmatprep.subr.mxu0 %v1077_v55  ;;  %v1264_v55 = vld [vmem:[#allocation6 + $0x698] sm:$0xff] }
 0x427   :  { %1410 = vmatpush1.msra.mxu0 %v1076_v56  ;;  %v1263_v56 = vld [vmem:[#allocation6 + $0x690] sm:$0xff] }
 0x428   :  { %1411 = vmatprep.subr.mxu0 %v1070_v57  ;;  %v1257_v57 = vld [vmem:[#allocation6 + $0x660] sm:$0xff] }
 0x429   :  { %1412 = vmatpush1.msra.mxu0 %v1069_v58  ;;  %v1256_v58 = vld [vmem:[#allocation6 + $0x658] sm:$0xff] }
 0x42a   :  { %1413 = vmatprep.subr.mxu0 %v1063_v59  ;;  %v1250_v59 = vld [vmem:[#allocation6 + $0x628] sm:$0xff] }
 0x42b   :  { %1414 = vmatpush1.msra.mxu0 %v1062_v60  ;;  %v1249_v60 = vld [vmem:[#allocation6 + $0x620] sm:$0xff] }
 0x42c   :  { %1415 = vmatprep.subr.mxu0 %v1056_v61  ;;  %v1243_v61 = vld [vmem:[#allocation6 + $0x5f0] sm:$0xff] }
 0x42d   :  { %1416 = vmatpush1.msra.mxu0 %v1055_v62  ;;  %v1242_v62 = vld [vmem:[#allocation6 + $0x5e8] sm:$0xff] }
 0x42e   :  { %1417 = vmatprep.subr.mxu0 %v1273_v63  ;;  %v1236_v63 = vld [vmem:[#allocation6 + $0x5b8] sm:$0xff] }
 0x42f   :  { %1418 = vmatpush2.msra.mxu0 %v1272_v0  ;;  %v1235_v0 = vld [vmem:[#allocation6 + $0x5b0] sm:$0xff] }
 0x430   :  { %1419 = vmatprep.subr.mxu0 %v1266_v1  ;;  %v1229_v1 = vld [vmem:[#allocation6 + $0x580] sm:$0xff] }
 0x431   :  { %1420 = vmatpush2.msra.mxu0 %v1265_v10  ;;  %v1228_v10 = vld [vmem:[#allocation6 + $0x578] sm:$0xff] }
 0x432   :  { %1421 = vmatprep.subr.mxu0 %v1259_v2  ;;  %v1230_v2 = vld [vmem:[#allocation6 + $0x588] sm:$0xff] }
 0x433   :  { %1422 = vmatpush2.msra.mxu0 %v1258_v3  ;;  %v1222_v3 = vld [vmem:[#allocation6 + $0x548] sm:$0xff] }
 0x434   :  { %1423 = vmatprep.subr.mxu0 %v1252_v4  ;;  %v1224_v4 = vld [vmem:[#allocation6 + $0x558] sm:$0xff] }
 0x435   :  { %1424 = vmatpush2.msra.mxu0 %v1251_v5  ;;  %v1221_v5 = vld [vmem:[#allocation6 + $0x540] sm:$0xff] }
 0x436   :  { %1425 = vmatprep.subr.mxu0 %v1245_v6  ;;  %v1223_v6 = vld [vmem:[#allocation6 + $0x550] sm:$0xff] }
 0x437   :  { %1426 = vmatpush2.msra.mxu0 %v1244_v7  ;;  %v1215_v7 = vld [vmem:[#allocation6 + $0x510] sm:$0xff] }
 0x438   :  { %1427 = vmatprep.subr.mxu0 %v1238_v8  ;;  %v1217_v8 = vld [vmem:[#allocation6 + $0x520] sm:$0xff] }
 0x439   :  { %1428 = vmatpush2.msra.mxu0 %v1237_v9  ;;  %v1214_v9 = vld [vmem:[#allocation6 + $0x508] sm:$0xff] }
 0x43a   :  { %1429 = vmatprep.subr.mxu0 %v1231_v12  ;;  %v1216_v12 = vld [vmem:[#allocation6 + $0x518] sm:$0xff] }
 0x43b   :  { %1430 = vmatpush2.msra.mxu0 %v1230_v2  ;;  %v1143_v2 = vld [vmem:[#allocation6 + $0x2d0] sm:$0xff] }
 0x43c   :  { %1431 = vmatprep.subr.mxu0 %v1224_v4  ;;  %v1248_v4 = vld [vmem:[#allocation6 + $0x618] sm:$0xff] }
 0x43d   :  { %1432 = vmatpush2.msra.mxu0 %v1223_v6  ;;  %v1136_v6 = vld [vmem:[#allocation6 + $0x298] sm:$0xff] }
 0x43e   :  { %1433 = vmatprep.subr.mxu0 %v1217_v8  ;;  %v1241_v8 = vld [vmem:[#allocation6 + $0x5e0] sm:$0xff] }
 0x43f   :  { %1434 = vmatpush2.msra.mxu0 %v1216_v12  ;;  %v1129_v12 = vld [vmem:[#allocation6 + $0x260] sm:$0xff] }
 0x489   :  { %v938_v13 = vpop.permute.xlu1 %937  ;;  %v934_v14 = vpop.permute.xlu0 %933 }
 0x48a   :  { %v945_v15 = vsel %vm944_vm2, %v928_v34, %v934_v14  ;;  %v1110_v34 = vld [vmem:[#allocation6 + $0x1c8] sm:$0xff] }
 0x48b   :  { %v946_v17 = vsel %vm285_vm0, %v945_v15, %v938_v13  ;;  %v1208_v13 = vld [vmem:[#allocation6 + $0x4d8] sm:$0xff]  ;;  %v1210_v14 = vld [vmem:[#allocation6 + $0x4e8] sm:$0xff]  ;;  %v1207_v15 = vld [vmem:[#allocation6 + $0x4d0] sm:$0xff] }
 0x48c   :  { %1435 = vmatprep.subr.mxu0 %v1210_v14  ;;  %v1234_v14 = vld [vmem:[#allocation6 + $0x5a8] sm:$0xff] }
 0x48d   :  { %v942_v16 = vpop.permute.xlu1 %941  ;;  %v953_v21 = vpop.permute.xlu0 %952 }
 0x48e   :  { %v948_v19 = vsel %vm947_vm3, %v946_v17, %v942_v16  ;;  %v1209_v16 = vld [vmem:[#allocation6 + $0x4e0] sm:$0xff] }
 0x48f   :  { %950 = vst.msk [vmem:[%s2250_s11] sm:$0xff] %vm949_vm4, %v948_v19  ;;  %1668 = vmatmul.mubr.msk.f32.vlgmr.msra.gmra.mxu1 %vm949_vm4, %v948_v19  ;;  %v1201_v17 = vld [vmem:[#allocation6 + $0x4a0] sm:$0xff]  ;;  %1436 = vmatpush2.msra.mxu0 %v1209_v16  ;;  %v1200_v19 = vld [vmem:[#allocation6 + $0x498] sm:$0xff]  ;;  %v1122_v16 = vld [vmem:[#allocation6 + $0x228] sm:$0xff] }
 0x490   :  { %956 = vst.msk [vmem:[%s2250_s11] sm:$0xff] %vm955_vm5, %v953_v21  ;;  %1315 = vmatpush1.msra.mxu1 %v1158_v18  ;;  %v1203_v18 = vld [vmem:[#allocation6 + $0x4b0] sm:$0xff]  ;;  %v1194_v21 = vld [vmem:[#allocation6 + $0x468] sm:$0xff] }
 0x491   :  { %1316 = vmatprep.subr.mxu1 %v1152_v20  ;;  %v1202_v20 = vld [vmem:[#allocation6 + $0x4a8] sm:$0xff]  ;;  %1437 = vmatprep.subr.mxu0 %v1203_v18  ;;  %v1227_v18 = vld [vmem:[#allocation6 + $0x570] sm:$0xff] }
 0x492   :  { %1317 = vmatpush1.msra.mxu1 %v1151_v22  ;;  %v1196_v22 = vld [vmem:[#allocation6 + $0x478] sm:$0xff]  ;;  %1438 = vmatpush2.msra.mxu0 %v1202_v20  ;;  %v1115_v20 = vld [vmem:[#allocation6 + $0x1f0] sm:$0xff] }
 0x493   :  { %1318 = vmatprep.subr.mxu1 %v1145_v24  ;;  %v1193_v24 = vld [vmem:[#allocation6 + $0x460] sm:$0xff]  ;;  %1439 = vmatprep.subr.mxu0 %v1196_v22  ;;  %v1220_v22 = vld [vmem:[#allocation6 + $0x538] sm:$0xff] }
 0x494   :  { %1319 = vmatpush1.msra.mxu1 %v1144_v25  ;;  %v1195_v25 = vld [vmem:[#allocation6 + $0x470] sm:$0xff] }
 0x495   :  { %1320 = vmatprep.subr.mxu1 %v1138_v26  ;;  %v1187_v26 = vld [vmem:[#allocation6 + $0x430] sm:$0xff]  ;;  %1440 = vmatpush2.msra.mxu0 %v1195_v25  ;;  %v1108_v25 = vld [vmem:[#allocation6 + $0x1b8] sm:$0xff] }
 0x496   :  { %1321 = vmatpush1.msra.mxu1 %v1137_v27  ;;  %v1189_v27 = vld [vmem:[#allocation6 + $0x440] sm:$0xff] }
 0x497   :  { %1322 = vmatprep.subr.mxu1 %v1131_v28  ;;  %v1186_v28 = vld [vmem:[#allocation6 + $0x428] sm:$0xff]  ;;  %1441 = vmatprep.subr.mxu0 %v1189_v27  ;;  %v1213_v27 = vld [vmem:[#allocation6 + $0x500] sm:$0xff] }
 0x498   :  { %1323 = vmatpush1.msra.mxu1 %v1130_v23  ;;  %v1188_v23 = vld [vmem:[#allocation6 + $0x438] sm:$0xff] }
 0x499   :  { %1324 = vmatprep.subr.mxu1 %v1124_v30  ;;  %v1180_v30 = vld [vmem:[#allocation6 + $0x3f8] sm:$0xff]  ;;  %1442 = vmatpush2.msra.mxu0 %v1188_v23  ;;  %v1101_v23 = vld [vmem:[#allocation6 + $0x180] sm:$0xff] }
 0x49a   :  { %1325 = vmatpush1.msra.mxu1 %v1123_v31  ;;  %v1182_v31 = vld [vmem:[#allocation6 + $0x408] sm:$0xff] }
 0x49b   :  { %1326 = vmatprep.subr.mxu1 %v1117_v32  ;;  %v1179_v32 = vld [vmem:[#allocation6 + $0x3f0] sm:$0xff]  ;;  %1443 = vmatprep.subr.mxu0 %v1182_v31  ;;  %v1206_v31 = vld [vmem:[#allocation6 + $0x4c8] sm:$0xff] }
 0x49c   :  { %1327 = vmatpush1.msra.mxu1 %v1116_v33  ;;  %v1181_v33 = vld [vmem:[#allocation6 + $0x400] sm:$0xff] }
 0x49d   :  { %1328 = vmatprep.subr.mxu1 %v1110_v34  ;;  %v1173_v34 = vld [vmem:[#allocation6 + $0x3c0] sm:$0xff]  ;;  %1444 = vmatpush2.msra.mxu0 %v1181_v33  ;;  %v1094_v33 = vld [vmem:[#allocation6 + $0x148] sm:$0xff] }
 0x49e   :  { %1329 = vmatpush1.msra.mxu1 %v1109_v35  ;;  %v1175_v35 = vld [vmem:[#allocation6 + $0x3d0] sm:$0xff] }
 0x49f   :  { %1330 = vmatprep.subr.mxu1 %v1103_v36  ;;  %v1172_v36 = vld [vmem:[#allocation6 + $0x3b8] sm:$0xff]  ;;  %1445 = vmatprep.subr.mxu0 %v1175_v35  ;;  %v1199_v35 = vld [vmem:[#allocation6 + $0x490] sm:$0xff] }
 0x4a0   :  { %1331 = vmatpush1.msra.mxu1 %v1102_v29  ;;  %v1174_v29 = vld [vmem:[#allocation6 + $0x3c8] sm:$0xff] }
 0x4a1   :  { %1332 = vmatprep.subr.mxu1 %v1096_v37  ;;  %v1166_v37 = vld [vmem:[#allocation6 + $0x388] sm:$0xff]  ;;  %1446 = vmatpush2.msra.mxu0 %v1174_v29  ;;  %v1087_v29 = vld [vmem:[#allocation6 + $0x110] sm:$0xff] }
 0x4a2   :  { %1333 = vmatpush1.msra.mxu1 %v1095_v38  ;;  %v1168_v38 = vld [vmem:[#allocation6 + $0x398] sm:$0xff] }
 0x4a3   :  { %1334 = vmatprep.subr.mxu1 %v1089_v39  ;;  %v1165_v39 = vld [vmem:[#allocation6 + $0x380] sm:$0xff]  ;;  %1447 = vmatprep.subr.mxu0 %v1168_v38  ;;  %v1192_v38 = vld [vmem:[#allocation6 + $0x458] sm:$0xff] }
 0x4a4   :  { %1335 = vmatpush1.msra.mxu1 %v1088_v40  ;;  %v1167_v40 = vld [vmem:[#allocation6 + $0x390] sm:$0xff] }
 0x4a5   :  { %1336 = vmatprep.subr.mxu1 %v1082_v41  ;;  %1448 = vmatpush2.msra.mxu0 %v1167_v40  ;;  %v1163_v41 = vld [vmem:[#allocation6 + $0x370] sm:$0xff]  ;;  %v1080_v40 = vld [vmem:[#allocation6 + $0xd8] sm:$0xff] }
 0x4a6   :  { %1337 = vmatpush1.msra.mxu1 %v1081_v42  ;;  %v1276_v42 = vld [vmem:[#allocation6 + $0x6f8] sm:$0xff] }
 0x4a7   :  { %1338 = vmatprep.subr.mxu1 %v1075_v43  ;;  %1711 = vmatprep.subr.mxu0 %v1276_v42  ;;  %v965_v43 = vld [vmem:[%s2247_s8] sm:$0x3] }
 0x4a8   :  { %1339 = vmatpush1.msra.mxu1 %v1074_v44  ;;  %v970_v44 = vrot.slane %v965_v43, %v2106_v46  ;;  %v1185_v42 = vld [vmem:[#allocation6 + $0x420] sm:$0xff] }
 0x4a9   :  { %1340 = vmatprep.subr.mxu1 %v1068_v47  ;;  %v974_v47 = vrot.slane %v965_v43, %v2112_v48  ;;  %v1071_v43 = vld [vmem:[#allocation6 + $0x90] sm:$0xff] }
 0x4aa   :  { %1341 = vmatpush1.msra.mxu1 %v1067_v49 }
 0x4ab   :  { %1342 = vmatprep.subr.mxu1 %v1061_v50 }
 0x4ac   :  { %1343 = vmatpush1.msra.mxu1 %v1060_v51 }
 0x4ad   :  { %1344 = vmatprep.subr.mxu1 %v1054_v52 }
 0x4ae   :  { %1345 = vmatpush1.msra.mxu1 %v1053_v11 }
 0x4af   :  { %1346 = vmatprep.subr.mxu1 %v1271_v53  ;;  %v1162_v53 = vld [vmem:[#allocation6 + $0x368] sm:$0xff] }
 0x4b0   :  { %1347 = vmatpush2.msra.mxu1 %v1270_v54  ;;  %v1164_v54 = vld [vmem:[#allocation6 + $0x378] sm:$0xff] }
 0x4b1   :  { %1348 = vmatprep.subr.mxu1 %v1264_v55 }
 0x4b2   :  { %1349 = vmatpush2.msra.mxu1 %v1263_v56  ;;  %v1156_v56 = vld [vmem:[#allocation6 + $0x338] sm:$0xff] }
 0x4b3   :  { %1350 = vmatprep.subr.mxu1 %v1257_v57  ;;  %v1269_v57 = vld [vmem:[#allocation6 + $0x6c0] sm:$0xff] }
 0x4b4   :  { %1351 = vmatpush2.msra.mxu1 %v1256_v58  ;;  %v1155_v58 = vld [vmem:[#allocation6 + $0x330] sm:$0xff] }
 0x4b5   :  { %1352 = vmatprep.subr.mxu1 %v1250_v59  ;;  %v1157_v59 = vld [vmem:[#allocation6 + $0x340] sm:$0xff] }
 0x4b6   :  { %1353 = vmatpush2.msra.mxu1 %v1249_v60  ;;  %v1149_v60 = vld [vmem:[#allocation6 + $0x300] sm:$0xff] }
 0x4b7   :  { %1354 = vmatprep.subr.mxu1 %v1243_v61  ;;  %v1262_v61 = vld [vmem:[#allocation6 + $0x688] sm:$0xff] }
 0x4b8   :  { %1355 = vmatpush2.msra.mxu1 %v1242_v62  ;;  %v1148_v62 = vld [vmem:[#allocation6 + $0x2f8] sm:$0xff] }
 0x4b9   :  { %1356 = vmatprep.subr.mxu1 %v1236_v63  ;;  %v1150_v63 = vld [vmem:[#allocation6 + $0x308] sm:$0xff] }
 0x4ba   :  { %1357 = vmatpush2.msra.mxu1 %v1235_v0  ;;  %v1142_v0 = vld [vmem:[#allocation6 + $0x2c8] sm:$0xff] }
 0x4bb   :  { %1358 = vmatprep.subr.mxu1 %v1229_v1  ;;  %v1255_v1 = vld [vmem:[#allocation6 + $0x650] sm:$0xff] }
 0x4bc   :  { %1359 = vmatpush2.msra.mxu1 %v1228_v10  ;;  %v1141_v10 = vld [vmem:[#allocation6 + $0x2c0] sm:$0xff] }
 0x4bd   :  { %1360 = vmatprep.subr.mxu1 %v1222_v3  ;;  %v1135_v3 = vld [vmem:[#allocation6 + $0x290] sm:$0xff] }
 0x4be   :  { %1361 = vmatpush2.msra.mxu1 %v1221_v5  ;;  %v1134_v5 = vld [vmem:[#allocation6 + $0x288] sm:$0xff] }
 0x4bf   :  { %1362 = vmatprep.subr.mxu1 %v1215_v7  ;;  %v1128_v7 = vld [vmem:[#allocation6 + $0x258] sm:$0xff] }
 0x4c0   :  { %1363 = vmatpush2.msra.mxu1 %v1214_v9  ;;  %v1127_v9 = vld [vmem:[#allocation6 + $0x250] sm:$0xff] }
 0x4c1   :  { %1364 = vmatprep.subr.mxu1 %v1208_v13  ;;  %v1121_v13 = vld [vmem:[#allocation6 + $0x220] sm:$0xff] }
 0x4c2   :  { %1365 = vmatpush2.msra.mxu1 %v1207_v15  ;;  %v1120_v15 = vld [vmem:[#allocation6 + $0x218] sm:$0xff] }
 0x4c3   :  { %1366 = vmatprep.subr.mxu1 %v1201_v17  ;;  %v1114_v17 = vld [vmem:[#allocation6 + $0x1e8] sm:$0xff] }
 0x4c4   :  { %1367 = vmatpush2.msra.mxu1 %v1200_v19  ;;  %v1113_v19 = vld [vmem:[#allocation6 + $0x1e0] sm:$0xff] }
 0x4c5   :  { %1368 = vmatprep.subr.mxu1 %v1194_v21  ;;  %v1107_v21 = vld [vmem:[#allocation6 + $0x1b0] sm:$0xff] }
 0x4c6   :  { %1369 = vmatpush2.msra.mxu1 %v1193_v24  ;;  %v1106_v24 = vld [vmem:[#allocation6 + $0x1a8] sm:$0xff] }
 0x4c7   :  { %1370 = vmatprep.subr.mxu1 %v1187_v26  ;;  %v1100_v26 = vld [vmem:[#allocation6 + $0x178] sm:$0xff] }
 0x4c8   :  { %1371 = vmatpush2.msra.mxu1 %v1186_v28  ;;  %v1099_v28 = vld [vmem:[#allocation6 + $0x170] sm:$0xff] }
 0x4c9   :  { %1372 = vmatprep.subr.mxu1 %v1180_v30  ;;  %v1093_v30 = vld [vmem:[#allocation6 + $0x140] sm:$0xff] }
 0x4ca   :  { %1373 = vmatpush2.msra.mxu1 %v1179_v32  ;;  %v1092_v32 = vld [vmem:[#allocation6 + $0x138] sm:$0xff] }
 0x4cb   :  { %1374 = vmatprep.subr.mxu1 %v1173_v34  ;;  %v1086_v34 = vld [vmem:[#allocation6 + $0x108] sm:$0xff] }
 0x4cc   :  { %1375 = vmatpush2.msra.mxu1 %v1172_v36  ;;  %v1085_v36 = vld [vmem:[#allocation6 + $0x100] sm:$0xff] }
 0x4cd   :  { %1376 = vmatprep.subr.mxu1 %v1166_v37  ;;  %v1079_v37 = vld [vmem:[#allocation6 + $0xd0] sm:$0xff] }
 0x4ce   :  { %1377 = vmatpush2.msra.mxu1 %v1165_v39  ;;  %v1078_v39 = vld [vmem:[#allocation6 + $0xc8] sm:$0xff] }
 0x4cf   :  { %1456 = vmatprep.subr.mxu1 %v1163_v41  ;;  %v1072_v41 = vld [vmem:[#allocation6 + $0x98] sm:$0xff] }
 0x54f   :  { %v1046_v49 = vpop.f32.mrf.mxu1 }
 0x550   :  { %v1047_v50 = vadd.f32 %v1046_v49, %v970_v44  ;;  %v1073_v44 = vld [vmem:[#allocation6 + $0xa0] sm:$0xff]  ;;  %v1178_v49 = vld [vmem:[#allocation6 + $0x3e8] sm:$0xff] }
 0x551   :  { %v1048_v51 = vpop.f32.mrf.mxu1 }
 0x552   :  { %v1049_v52 = vadd.f32 %v1048_v51, %v974_v47  ;;  %v1065_v47 = vld [vmem:[#allocation6 + $0x60] sm:$0xff]  ;;  %v1066_v51 = vld [vmem:[#allocation6 + $0x68] sm:$0xff] }
 0x554   :  { %1798 = vtanh.f32 %v1049_v52  ;;  %v1058_v52 = vld [vmem:[#allocation6 + $0x28] sm:$0xff] }
 0x555   :  { %1800 = vtanh.f32 %v1047_v50  ;;  %v1064_v50 = vld [vmem:[#allocation6 + $0x58] sm:$0xff] }
 0x561   :  { %v1799_v11 = vpop.eup %1798 }
 0x562   :  { %v2220_v55 = vpop.eup %1800  ;;  %1378 = vmatprep.mubr.f32.mxu1 %v1799_v11  ;;  %1449 = vmatprep.mubr.f32.mxu0 %v1799_v11 }
 0x563   :  { %1379 = vmatmul.mubr.f32.vlgmr.msra.gmra.mxu1 %v2220_v55  ;;  %1450 = vmatmul.mubr.f32.vlgmr.msra.gmra.mxu0 %v2220_v55 }
 0x564   :  { %1457 = vmatpush1.msra.mxu1 %v1162_v53  ;;  %1712 = vmatpush3.msra.mxu0 %v1164_v54  ;;  %v1057_v53 = vld [vmem:[#allocation6 + $0x20] sm:$0xff]  ;;  %v1059_v54 = vld [vmem:[#allocation6 + $0x30] sm:$0xff] }
 0x565   :  { %1458 = vmatprep.subr.mxu1 %v1156_v56  ;;  %1520 = vmatprep.mubr.f32.mxu1 %v1799_v11  ;;  %v1275_v56 = vld [vmem:[#allocation6 + $0x6f0] sm:$0xff] }
 0x566   :  { %1713 = vmatprep.subr.mxu0 %v1269_v57  ;;  %1591 = vmatprep.mubr.f32.mxu0 %v1799_v11  ;;  %v1171_v11 = vld [vmem:[#allocation6 + $0x3b0] sm:$0xff]  ;;  %v1274_v57 = vld [vmem:[#allocation6 + $0x6e8] sm:$0xff] }
 0x567   :  { %1459 = vmatpush1.msra.mxu1 %v1155_v58  ;;  %1714 = vmatpush3.msra.mxu0 %v1157_v59  ;;  %v1268_v58 = vld [vmem:[#allocation6 + $0x6b8] sm:$0xff]  ;;  %v1267_v59 = vld [vmem:[#allocation6 + $0x6b0] sm:$0xff] }
 0x568   :  { %1460 = vmatprep.subr.mxu1 %v1149_v60  ;;  %1715 = vmatprep.subr.mxu0 %v1262_v61  ;;  %v1261_v60 = vld [vmem:[#allocation6 + $0x680] sm:$0xff]  ;;  %v1260_v61 = vld [vmem:[#allocation6 + $0x678] sm:$0xff] }
 0x569   :  { %1461 = vmatpush1.msra.mxu1 %v1148_v62  ;;  %1716 = vmatpush3.msra.mxu0 %v1150_v63  ;;  %v1254_v62 = vld [vmem:[#allocation6 + $0x648] sm:$0xff]  ;;  %v1253_v63 = vld [vmem:[#allocation6 + $0x640] sm:$0xff] }
 0x56a   :  { %1462 = vmatprep.subr.mxu1 %v1142_v0  ;;  %1717 = vmatprep.subr.mxu0 %v1255_v1  ;;  %v1247_v0 = vld [vmem:[#allocation6 + $0x610] sm:$0xff]  ;;  %v1246_v1 = vld [vmem:[#allocation6 + $0x608] sm:$0xff] }
 0x56b   :  { %1463 = vmatpush1.msra.mxu1 %v1141_v10  ;;  %1718 = vmatpush3.msra.mxu0 %v1143_v2  ;;  %v1240_v10 = vld [vmem:[#allocation6 + $0x5d8] sm:$0xff]  ;;  %v1239_v2 = vld [vmem:[#allocation6 + $0x5d0] sm:$0xff] }
 0x56c   :  { %1464 = vmatprep.subr.mxu1 %v1135_v3  ;;  %1719 = vmatprep.subr.mxu0 %v1248_v4  ;;  %v1233_v3 = vld [vmem:[#allocation6 + $0x5a0] sm:$0xff]  ;;  %v1232_v4 = vld [vmem:[#allocation6 + $0x598] sm:$0xff] }
 0x56d   :  { %1465 = vmatpush1.msra.mxu1 %v1134_v5  ;;  %1720 = vmatpush3.msra.mxu0 %v1136_v6  ;;  %v1226_v5 = vld [vmem:[#allocation6 + $0x568] sm:$0xff]  ;;  %v1225_v6 = vld [vmem:[#allocation6 + $0x560] sm:$0xff] }
 0x56e   :  { %1466 = vmatprep.subr.mxu1 %v1128_v7  ;;  %1721 = vmatprep.subr.mxu0 %v1241_v8  ;;  %v1219_v7 = vld [vmem:[#allocation6 + $0x530] sm:$0xff]  ;;  %v1218_v8 = vld [vmem:[#allocation6 + $0x528] sm:$0xff] }
 0x56f   :  { %1467 = vmatpush1.msra.mxu1 %v1127_v9  ;;  %1722 = vmatpush3.msra.mxu0 %v1129_v12  ;;  %v1212_v9 = vld [vmem:[#allocation6 + $0x4f8] sm:$0xff]  ;;  %v1211_v12 = vld [vmem:[#allocation6 + $0x4f0] sm:$0xff] }
 0x570   :  { %1468 = vmatprep.subr.mxu1 %v1121_v13  ;;  %1723 = vmatprep.subr.mxu0 %v1234_v14  ;;  %v1205_v13 = vld [vmem:[#allocation6 + $0x4c0] sm:$0xff]  ;;  %v1204_v14 = vld [vmem:[#allocation6 + $0x4b8] sm:$0xff] }
 0x571   :  { %1469 = vmatpush1.msra.mxu1 %v1120_v15  ;;  %1724 = vmatpush3.msra.mxu0 %v1122_v16  ;;  %v1198_v15 = vld [vmem:[#allocation6 + $0x488] sm:$0xff]  ;;  %v1197_v16 = vld [vmem:[#allocation6 + $0x480] sm:$0xff] }
 0x572   :  { %1470 = vmatprep.subr.mxu1 %v1114_v17  ;;  %1725 = vmatprep.subr.mxu0 %v1227_v18  ;;  %v1191_v17 = vld [vmem:[#allocation6 + $0x450] sm:$0xff]  ;;  %v1190_v18 = vld [vmem:[#allocation6 + $0x448] sm:$0xff] }
 0x573   :  { %1471 = vmatpush1.msra.mxu1 %v1113_v19  ;;  %1726 = vmatpush3.msra.mxu0 %v1115_v20  ;;  %v1184_v19 = vld [vmem:[#allocation6 + $0x418] sm:$0xff]  ;;  %v1183_v20 = vld [vmem:[#allocation6 + $0x410] sm:$0xff] }
 0x574   :  { %1472 = vmatprep.subr.mxu1 %v1107_v21  ;;  %1727 = vmatprep.subr.mxu0 %v1220_v22  ;;  %v1177_v21 = vld [vmem:[#allocation6 + $0x3e0] sm:$0xff]  ;;  %v1176_v22 = vld [vmem:[#allocation6 + $0x3d8] sm:$0xff] }
 0x575   :  { %1473 = vmatpush1.msra.mxu1 %v1106_v24  ;;  %1728 = vmatpush3.msra.mxu0 %v1108_v25  ;;  %v1170_v24 = vld [vmem:[#allocation6 + $0x3a8] sm:$0xff]  ;;  %v1169_v25 = vld [vmem:[#allocation6 + $0x3a0] sm:$0xff] }
 0x576   :  { %1474 = vmatprep.subr.mxu1 %v1100_v26  ;;  %1729 = vmatprep.subr.mxu0 %v1213_v27  ;;  %v1289_v26 = vsub.s32 2, %v2103_v45  ;;  %v1277_v27 = vld [vmem:[%s2249_s10] sm:$0xff]  ;;  %s1911_s10 = smov [#allocation8]  }
 0x577   :  { %1475 = vmatpush1.msra.mxu1 %v1099_v28  ;;  %1730 = vmatpush3.msra.mxu0 %v1101_v23  ;;  %v1293_v28 = vsub.s32 3, %v2103_v45  ;;  %v1282_v23 = vrot.slane %v1277_v27, %v2106_v46  ;;  %s1654_s20 = sshll.u32 %s1911_s10, 4  ;;  %s1655_s20 = int_to_ptr.vmem [resolvable:$true] %s1654_s20 }
 0x578   :  { %1476 = vmatprep.subr.mxu1 %v1093_v30  ;;  %1731 = vmatprep.subr.mxu0 %v1206_v31  ;;  %v1290_v30 = vrot.slane %v1277_v27, %v1289_v26  ;;  %v1286_v31 = vrot.slane %v1277_v27, %v2112_v48  ;;  %s1870_s6 = scalar_lea.vmem %s1655_s20, 896  ;;  %p1875_p11 = scmp.lt.s32.totalorder %s1655_s20, %s1655_s20 }
 0x579   :  { %1477 = vmatpush1.msra.mxu1 %v1092_v32  ;;  %1732 = vmatpush3.msra.mxu0 %v1094_v33  ;;  %v1294_v32 = vrot.slane %v1277_v27, %v1293_v28  ;;  %p1871_p10 = scmp.ne.s32.totalorder %s1655_s20, %s1870_s6  ;;  %p1876_p12 = scmp.lt.s32.totalorder %s1870_s6, %s1870_s6 }
 0x57a   :  { %1478 = vmatprep.subr.mxu1 %v1086_v34  ;;  %1733 = vmatprep.subr.mxu0 %v1199_v35 }
 0x57b   :  { %1479 = vmatpush1.msra.mxu1 %v1085_v36  ;;  %1734 = vmatpush3.msra.mxu0 %v1087_v29  ;;  %p1877_p13 = por %p1876_p12, %p1875_p11 }
 0x57c   :  { %1480 = vmatprep.subr.mxu1 %v1079_v37  ;;  %1735 = vmatprep.subr.mxu0 %v1192_v38 }
 0x57d   :  { %1481 = vmatpush1.msra.mxu1 %v1078_v39  ;;  %1736 = vmatpush3.msra.mxu0 %v1080_v40  ;;  %p1878_p0 = pnand %p1877_p13, %p1871_p10 }
 0x57e   :  { %1482 = vmatprep.subr.mxu1 %v1072_v41  ;;  %1737 = vmatprep.subr.mxu0 %v1185_v42 }
 0x57f   :  { %1483 = vmatpush1.msra.mxu1 %v1071_v43  ;;  %1738 = vmatpush3.msra.mxu0 %v1073_v44 }
 0x580   :  { %1484 = vmatprep.subr.mxu1 %v1065_v47  ;;  %1739 = vmatprep.subr.mxu0 %v1178_v49 }
 0x581   :  { %1485 = vmatpush1.msra.mxu1 %v1064_v50  ;;  %1740 = vmatpush3.msra.mxu0 %v1066_v51 }
 0x582   :  { %1486 = vmatprep.subr.mxu1 %v1058_v52  ;;  %1741 = vmatprep.subr.mxu0 %v1171_v11  ;;  %v1305_v52 = vsub.s32 6, %v2103_v45 }
 0x583   :  { %1487 = vmatpush1.msra.mxu1 %v1057_v53  ;;  %1742 = vmatpush3.msra.mxu0 %v1059_v54 }
 0x584   :  { %1488 = vmatprep.subr.mxu1 %v1275_v56  ;;  %1592 = vmatmul.mubr.f32.vlgmr.msra.gmra.mxu0 %v2220_v55  ;;  %v1306_v54 = vrot.slane %v1277_v27, %v1305_v52 }
 0x585   :  { %1489 = vmatpush2.msra.mxu1 %v1274_v57 }
 0x586   :  { %1490 = vmatprep.subr.mxu1 %v1268_v58 }
 0x587   :  { %1491 = vmatpush2.msra.mxu1 %v1267_v59 }
 0x588   :  { %1492 = vmatprep.subr.mxu1 %v1261_v60 }
 0x589   :  { %1493 = vmatpush2.msra.mxu1 %v1260_v61 }
 0x58a   :  { %1494 = vmatprep.subr.mxu1 %v1254_v62 }
 0x58b   :  { %1495 = vmatpush2.msra.mxu1 %v1253_v63 }
 0x58c   :  { %1496 = vmatprep.subr.mxu1 %v1247_v0 }
 0x58d   :  { %1497 = vmatpush2.msra.mxu1 %v1246_v1  ;;  %v1297_v1 = vsub.s32 4, %v2103_v45 }
 0x58e   :  { %1498 = vmatprep.subr.mxu1 %v1240_v10  ;;  %v1301_v10 = vsub.s32 5, %v2103_v45 }
 0x58f   :  { %1499 = vmatpush2.msra.mxu1 %v1239_v2  ;;  %v1298_v2 = vrot.slane %v1277_v27, %v1297_v1 }
 0x590   :  { %1500 = vmatprep.subr.mxu1 %v1233_v3  ;;  %v1302_v3 = vrot.slane %v1277_v27, %v1301_v10 }
 0x591   :  { %1501 = vmatpush2.msra.mxu1 %v1232_v4 }
 0x592   :  { %1502 = vmatprep.subr.mxu1 %v1226_v5 }
 0x593   :  { %1503 = vmatpush2.msra.mxu1 %v1225_v6 }
 0x594   :  { %1504 = vmatprep.subr.mxu1 %v1219_v7 }
 0x595   :  { %1505 = vmatpush2.msra.mxu1 %v1218_v8 }
 0x596   :  { %1506 = vmatprep.subr.mxu1 %v1212_v9 }
 0x597   :  { %1507 = vmatpush2.msra.mxu1 %v1211_v12 }
 0x598   :  { %1508 = vmatprep.subr.mxu1 %v1205_v13 }
 0x599   :  { %1509 = vmatpush2.msra.mxu1 %v1204_v14 }
 0x59a   :  { %1510 = vmatprep.subr.mxu1 %v1198_v15 }
 0x59b   :  { %1511 = vmatpush2.msra.mxu1 %v1197_v16 }
 0x59c   :  { %1512 = vmatprep.subr.mxu1 %v1191_v17 }
 0x59d   :  { %1513 = vmatpush2.msra.mxu1 %v1190_v18 }
 0x59e   :  { %1514 = vmatprep.subr.mxu1 %v1184_v19 }
 0x59f   :  { %1515 = vmatpush2.msra.mxu1 %v1183_v20 }
 0x5a0   :  { %1516 = vmatprep.subr.mxu1 %v1177_v21 }
 0x5a1   :  { %1517 = vmatpush2.msra.mxu1 %v1176_v22 }
 0x5a2   :  { %1518 = vmatprep.subr.mxu1 %v1170_v24 }
 0x5a3   :  { %1519 = vmatpush2.msra.mxu1 %v1169_v25 }
 0x5a4   :  { %1521 = vmatmul.mubr.f32.vlgmr.msra.gmra.mxu1 %v2220_v55 }
 0x623   :  { %v1380_v33 = vpop.f32.mrf.mxu1  ;;  %v1451_v34 = vpop.f32.mrf.mxu0 }
 0x624   :  { %v1381_v35 = vadd.f32 %v1380_v33, %v1282_v23  ;;  %v1452_v36 = vadd.f32 %v1451_v34, %v1290_v30 }
 0x625   :  { %v1382_v29 = vpop.f32.mrf.mxu1  ;;  %v1453_v55 = vpop.f32.mrf.mxu0 }
 0x626   :  { %v1669_v37 = vmul.f32 -1.442695, %v1381_v35  ;;  %v1671_v38 = vmul.f32 -1.442695, %v1452_v36  ;;  %v1383_v39 = vadd.f32 %v1382_v29, %v1286_v31  ;;  %v1454_v40 = vadd.f32 %v1453_v55, %v1294_v32 }
 0x628   :  { %1802 = vpow2.f32 %v1669_v37  ;;  %v1670_v41 = vmul.f32 -1.442695, %v1383_v39  ;;  %v1672_v42 = vmul.f32 -1.442695, %v1454_v40 }
 0x629   :  { %1804 = vpow2.f32 %v1671_v38 }
 0x62a   :  { %1806 = vpow2.f32 %v1670_v41 }
 0x62b   :  { %1808 = vpow2.f32 %v1672_v42 }
 0x635   :  { %v1803_v46 = vpop.eup %1802 }
 0x636   :  { %v1805_v43 = vpop.eup %1804  ;;  %v1618_v48 = vadd.f32 1.0, %v1803_v46 }
 0x637   :  { %v1807_v44 = vpop.eup %1806  ;;  %v1620_v47 = vadd.f32 1.0, %v1805_v43 }
 0x638   :  { %v1809_v49 = vpop.eup %1808  ;;  %1810 = vrcp.f32 %v1618_v48  ;;  %v1619_v50 = vadd.f32 1.0, %v1807_v44 }
 0x639   :  { %1812 = vrcp.f32 %v1620_v47  ;;  %v1621_v51 = vadd.f32 1.0, %v1809_v49 }
 0x63a   :  { %1814 = vrcp.f32 %v1619_v50 }
 0x63b   :  { %1816 = vrcp.f32 %v1621_v51 }
 0x644   :  { %v1743_v11 = vpop.f32.mrf.mxu0 }
 0x645   :  { %v1811_v53 = vpop.eup %1810 }
 0x646   :  { %v1813_v56 = vpop.eup %1812  ;;  %1639 = vst [vmem:[#allocation8] sm:$0xff] %v1811_v53  ;;  %v1744_v57 = vpop.f32.mrf.mxu0 }
 0x647   :  { %v1815_v58 = vpop.eup %1814  ;;  %1641 = vst [vmem:[#allocation8 + $0x10] sm:$0xff] %v1813_v56  ;;  %v1745_v59 = vadd.f32 %v1744_v57, %v1743_v11 }
 0x648   :  { %v1817_v60 = vpop.eup %1816  ;;  %1640 = vst [vmem:[#allocation8 + $0x8] sm:$0xff] %v1815_v58 }
 0x649   :  { %1642 = vst [vmem:[#allocation8 + $0x18] sm:$0xff] %v1817_v60  ;;  %v1594_v61 = vadd.f32 %v1745_v59, %v1306_v54 }
 0x64b   :  { %v1675_v62 = vmul.f32 -1.442695, %v1594_v61 }
 0x64d   :  { %1818 = vpow2.f32 %v1675_v62 }
 0x65a   :  { %v1819_v63 = vpop.eup %1818 }
 0x65b   :  { %v1624_v0 = vadd.f32 1.0, %v1819_v63 }
 0x65d   :  { %1820 = vrcp.f32 %v1624_v0 }
 0x664   :  { %v1522_v4 = vpop.f32.mrf.mxu1 }
 0x665   :  { %v1523_v5 = vadd.f32 %v1522_v4, %v1298_v2 }
 0x666   :  { %v1524_v6 = vpop.f32.mrf.mxu1 }
 0x667   :  { %v1673_v7 = vmul.f32 -1.442695, %v1523_v5  ;;  %v1525_v8 = vadd.f32 %v1524_v6, %v1302_v3 }
 0x669   :  { %1822 = vpow2.f32 %v1673_v7  ;;  %v1674_v9 = vmul.f32 -1.442695, %v1525_v8 }
 0x66a   :  { %v1821_v12 = vpop.eup %1820 }
 0x66b   :  { %1645 = vst [vmem:[#allocation8 + $0x30] sm:$0xff] %v1821_v12  ;;  %1824 = vpow2.f32 %v1674_v9 }
 0x676   :  { %v1823_v13 = vpop.eup %1822 }
 0x677   :  { %v1622_v14 = vadd.f32 1.0, %v1823_v13 }
 0x678   :  { %v1825_v15 = vpop.eup %1824 }
 0x679   :  { %1826 = vrcp.f32 %v1622_v14  ;;  %v1623_v16 = vadd.f32 1.0, %v1825_v15 }
 0x67b   :  { %1828 = vrcp.f32 %v1623_v16 }
 0x686   :  { %v1827_v45 = vpop.eup %1826 }
 0x687   :  { %1643 = vst [vmem:[#allocation8 + $0x20] sm:$0xff] %v1827_v45 }
 0x688   :  { %v1829_v17 = vpop.eup %1828 }
 0x689   :  { %1644 = vst [vmem:[#allocation8 + $0x28] sm:$0xff] %v1829_v17 }
 0x68a   :  { %1881 = shalt.err (!%p1878_p0)
}
 0x68b   :  { %1657 = dma.vmem_to_hbm [thread:$0]  %s1655_s20, 896, %s2251_s12, [#allocation5]  }
 0x68c   :  { %1894 = dma.done.wait [#allocation5], 896  }
 0x68d   :  { %1895 = vsyncadd [#allocation5], 4294966400 }
 0x68e   :  { %1663 = vsyncpa [#allocation4], 1 }
 0x68f   :  { %1664 = vsyncpa [#allocation7], 1 }
 0x690   :  { %1665 = vsyncpa [#allocation5], 1 }

</bundles_post_ra>
